<compile_context>
chip_gen: v7x
topology: tpu7x:2x2x1
jax: 0.10.0
libtpu: 0.0.40
codegen_flags: <defaults>
</compile_context>

<pallas_src>
import jax
import jax.numpy as jnp
import numpy as np
from jax.experimental import pallas as pl
from jax.experimental.pallas import tpu as pltpu

# -------------------- hyperparameters (small, deterministic) --------------------
VOCAB_SIZE = 65
N_EMBD = 32
BLOCK_SIZE = 8            # max sequence length (power of two -> shift/and pos ids in-kernel)
N_HEAD = 4
HEAD_SIZE = N_EMBD // N_HEAD
N_LAYER = 2
DROPOUT = 0.0             # TODO(synk): dropout is eval-mode identity; not applied in-kernel
V_PAD = 128               # lane-padded vocab / slab width (lane-dense stores)
NEG_INF = -1e30           # finite "-inf": fully-masked rows stay NaN-free


# -------------------------- Pallas kernel --------------------------

def _gpt_kernel(idx_ref, kmask_ref, emb_ref, pos_ref,
                wqkv_ref, wproj_ref, wfc1_ref, wfc2_ref, wlm_ref,
                vec_ref, out_ref):
    """Whole GPT forward (all batch elements, all layers) in ONE grid step.

    idx_ref:   (B, T)        int32 token ids
    kmask_ref: (1, B*T)      f32 key-validity mask (1.0 = valid position)
    emb_ref:   (V_PAD, C)    token embedding table, vocab rows zero-padded to 128
    pos_ref:   (B*T, C)      position embeddings, pre-tiled over the batch
    wqkv_ref:  (L, C, 3C)    stacked Q|K|V weights, 1/sqrt(head_size) folded into Q columns
    wproj_ref: (L, C, C)     attention output projection
    wfc1_ref:  (L, C, 4C)    FFN in
    wfc2_ref:  (L, 4C, C)    FFN out
    wlm_ref:   (C, V_PAD)    lm_head weight, lane-padded
    vec_ref:   (L+1, 8, 128) packed vectors; per-layer rows:
                             0 ln1_g, 1 ln1_b, 2 ln2_g, 3 ln2_b, 4 bproj, 5 bfc2, 6 bfc1;
                             row block L: 0 lnf_g, 1 lnf_b, 2 blm (lane-padded)
    out_ref:   (B*T, V_PAD)  lane-dense logits slab
    """
    B, T = idx_ref.shape
    BT, C = pos_ref.shape
    L = wqkv_ref.shape[0]
    hs = C // N_HEAD
    Vp = emb_ref.shape[0]

    # ---- token + position embedding: one-hot gather rides the (idle) MXU ----
    idx = idx_ref[...]                                                      # (B, T) int32
    onehot = (jax.lax.broadcasted_iota(jnp.int32, (B, T, Vp), 2) == idx[:, :, None])
    onehot = onehot.astype(jnp.float32).reshape(BT, Vp)                     # (BT, Vp)
    h = jnp.dot(onehot, emb_ref[...], preferred_element_type=jnp.float32) + pos_ref[...]

    # ---- additive attention-mask bias (block-diag over batch + causal + padding) ----
    # Built ONCE per call; T is a power of two (BLOCK_SIZE) so batch/pos ids use
    # shift/and instead of vector integer div/mod.
    rows = jax.lax.broadcasted_iota(jnp.int32, (BT, BT), 0)
    cols = jax.lax.broadcasted_iota(jnp.int32, (BT, BT), 1)
    tb = T.bit_length() - 1
    same_seq = (rows >> tb) == (cols >> tb)
    causal = (cols & (T - 1)) <= (rows & (T - 1))
    kvalid = kmask_ref[...] > 0.5                                           # (1, BT) broadcast
    keep = jnp.logical_and(jnp.logical_and(same_seq, causal), kvalid)
    bias = jnp.where(keep, 0.0, NEG_INF).astype(jnp.float32)                # (BT, BT)
    bias_h = jnp.concatenate([bias] * N_HEAD, axis=0)                       # (H*BT, BT)
    # NOTE: a fully-padded query row would see uniform weights over all BT keys
    # (garbage either way); such rows do not occur with a left-aligned valid mask.

    def _ln(z, g, b):
        mu = jnp.mean(z, axis=-1, keepdims=True)
        d = z - mu
        var = jnp.mean(d * d, axis=-1, keepdims=True)
        return d * jax.lax.rsqrt(var + 1e-5) * g + b

    for l in range(L):                              # static unroll over layers (L small)
        vecs = vec_ref[l]                           # (8, 128) packed per-layer vectors
        ln1_g, ln1_b = vecs[0:1, :C], vecs[1:2, :C]
        ln2_g, ln2_b = vecs[2:3, :C], vecs[3:4, :C]
        bproj, bfc2 = vecs[4:5, :C], vecs[5:6, :C]
        bfc1 = vecs[6:7, :]                         # (1, 4C) == (1, 128)

        # ---- multi-head self-attention: one QKV matmul, ONE stacked softmax ----
        xn = _ln(h, ln1_g, ln1_b)
        qkv = jnp.dot(xn, wqkv_ref[l], preferred_element_type=jnp.float32)   # (BT, 3C)

        s_list = []
        for hd in range(N_HEAD):                    # static unroll over heads
            q = qkv[:, hd * hs:(hd + 1) * hs]
            k = qkv[:, C + hd * hs: C + (hd + 1) * hs]
            # scores = q @ k^T via dot_general contracting on head_size (no k.T)
            s_list.append(jax.lax.dot_general(q, k, (((1,), (1,)), ((), ())),
                                              preferred_element_type=jnp.float32))
        s = jnp.concatenate(s_list, axis=0) + bias_h                         # (H*BT, BT)
        m = jnp.max(s, axis=-1, keepdims=True)
        p = jnp.exp(s - m)
        p = p / jnp.sum(p, axis=-1, keepdims=True)   # exact softmax denominator
        # TODO(synk): attention / residual dropout skipped (eval-mode identity).

        wproj_l = wproj_ref[l]                       # (C, C)
        att = None
        for hd in range(N_HEAD):
            p_h = p[hd * BT:(hd + 1) * BT]                                   # sublane slice
            v_h = qkv[:, 2 * C + hd * hs: 2 * C + (hd + 1) * hs]
            o_h = jnp.dot(p_h, v_h, preferred_element_type=jnp.float32)      # (BT, hs)
            # fold the output projection into the head loop: no lane-concat of heads
            c_h = jnp.dot(o_h, wproj_l[hd * hs:(hd + 1) * hs, :],
                          preferred_element_type=jnp.float32)                # (BT, C)
            att = c_h if att is None else att + c_h
        h = h + att + bproj

        # ---- feed-forward ----
        xn2 = _ln(h, ln2_g, ln2_b)
        f = jnp.maximum(
            jnp.dot(xn2, wfc1_ref[l], preferred_element_type=jnp.float32) + bfc1, 0.0)
        h = h + jnp.dot(f, wfc2_ref[l], preferred_element_type=jnp.float32) + bfc2

    # ---- final layer norm + lm_head (lane-dense V_PAD columns) ----
    fin = vec_ref[L]
    lnf_g, lnf_b, blm = fin[0:1, :C], fin[1:2, :C], fin[2:3, :]
    hn = _ln(h, lnf_g, lnf_b)
    out_ref[...] = (jnp.dot(hn, wlm_ref[...], preferred_element_type=jnp.float32)
                    + blm).astype(out_ref.dtype)


# -------------------------- wrapper --------------------------

@jax.jit
def gpt_forward(idx, key_mask, kp):
    """idx: (B, T) int32; key_mask: (1, B*T) f32 (1.0 = valid key position).

    Returns the lane-padded (B*T, V_PAD) logits slab; consumers slice [:, :VOCAB_SIZE]
    and reshape to (B, T, V) (done on the host in the correctness check below).
    """
    B, T = idx.shape
    BT = B * T
    C = kp["pos_tiled"].shape[-1]
    L = kp["wqkv"].shape[0]
    Dff = kp["wfc1"].shape[-1]
    Vp = kp["wlm_pad"].shape[-1]

    return pl.pallas_call(
        _gpt_kernel,
        out_shape=jax.ShapeDtypeStruct((BT, Vp), jnp.float32),
        grid_spec=pltpu.PrefetchScalarGridSpec(
            num_scalar_prefetch=0,
            # Single grid step: whole batch folded into the matmul M dimension.
            # TODO(synk): on TPU v7x split the batch into 2 "parallel" grid chunks
            # (one per TensorCore); v5e/v6e have a single TC so one step is optimal.
            grid=(1,),
            in_specs=[
                pl.BlockSpec((B, T), lambda i: (0, 0)),               # idx (int32)
                pl.BlockSpec((1, BT), lambda i: (0, 0)),              # key-validity mask
                pl.BlockSpec((Vp, C), lambda i: (0, 0)),              # tok_emb (row-padded)
                pl.BlockSpec((BT, C), lambda i: (0, 0)),              # pos_emb (pre-tiled)
                pl.BlockSpec((L, C, 3 * C), lambda i: (0, 0, 0)),     # wqkv (scale folded)
                pl.BlockSpec((L, C, C), lambda i: (0, 0, 0)),         # wproj
                pl.BlockSpec((L, C, Dff), lambda i: (0, 0, 0)),       # wfc1
                pl.BlockSpec((L, Dff, C), lambda i: (0, 0, 0)),       # wfc2
                pl.BlockSpec((C, Vp), lambda i: (0, 0)),              # wlm (lane-padded)
                pl.BlockSpec((L + 1, 8, Vp), lambda i: (0, 0, 0)),    # packed LN/bias slab
            ],
            out_specs=pl.BlockSpec((BT, Vp), lambda i: (0, 0)),
        ),
        compiler_params=pltpu.CompilerParams(
            dimension_semantics=("arbitrary",)),
    )(idx, key_mask, kp["emb_pad"], kp["pos_tiled"],
      kp["wqkv"], kp["wproj"], kp["wfc1"], kp["wfc2"], kp["wlm_pad"], kp["vec"])


# -------------------------- reference (pure JAX, mirrors the PyTorch module) --------------------------

def _layer_norm_ref(x, g, b, eps=1e-5):
    mu = jnp.mean(x, axis=-1, keepdims=True)
    var = jnp.mean((x - mu) ** 2, axis=-1, keepdims=True)
    return (x - mu) / jnp.sqrt(var + eps) * g + b


def _reference_forward(idx, mask, params):
    x = params["tok_emb"][idx] + params["pos_emb"][: idx.shape[1]][None]
    B, T, C = x.shape
    causal = jnp.tril(jnp.ones((T, T), dtype=bool))
    for l in range(N_LAYER):
        xn = _layer_norm_ref(x, params["ln1_g"][l], params["ln1_b"][l])
        heads = []
        for hd in range(N_HEAD):
            q = xn @ params["wq"][l, hd]
            k = xn @ params["wk"][l, hd]
            v = xn @ params["wv"][l, hd]
            s = (q @ jnp.swapaxes(k, -1, -2)) * (HEAD_SIZE ** -0.5)
            s = jnp.where(causal[None], s, NEG_INF)
            s = jnp.where(mask[:, None, :] > 0.5, s, NEG_INF)
            p = jax.nn.softmax(s, axis=-1)
            heads.append(p @ v)
        cat = jnp.concatenate(heads, axis=-1)
        x = x + cat @ params["wproj"][l] + params["bproj"][l]
        xn2 = _layer_norm_ref(x, params["ln2_g"][l], params["ln2_b"][l])
        ff = jax.nn.relu(xn2 @ params["wfc1"][l] + params["bfc1"][l])
        x = x + ff @ params["wfc2"][l] + params["bfc2"][l]
    xf = _layer_norm_ref(x, params["lnf_g"], params["lnf_b"])
    return xf @ params["wlm"] + params["blm"]


# -------------------------- main --------------------------

if __name__ == "__main__":
    key = jax.random.PRNGKey(0)
    ks = jax.random.split(key, 16)

    B, T = 2, BLOCK_SIZE

    def nrm(k, shape, std=0.02):
        return (std * jax.random.normal(k, shape)).astype(jnp.float32)

    params = {
        "tok_emb": nrm(ks[0], (VOCAB_SIZE, N_EMBD)),
        "pos_emb": nrm(ks[1], (BLOCK_SIZE, N_EMBD)),
        "wq": nrm(ks[2], (N_LAYER, N_HEAD, N_EMBD, HEAD_SIZE)),
        "wk": nrm(ks[3], (N_LAYER, N_HEAD, N_EMBD, HEAD_SIZE)),
        "wv": nrm(ks[4], (N_LAYER, N_HEAD, N_EMBD, HEAD_SIZE)),
        "wproj": nrm(ks[5], (N_LAYER, N_EMBD, N_EMBD)),
        "bproj": jnp.zeros((N_LAYER, 1, N_EMBD), jnp.float32),
        "wfc1": nrm(ks[6], (N_LAYER, N_EMBD, 4 * N_EMBD)),
        "bfc1": jnp.zeros((N_LAYER, 1, 4 * N_EMBD), jnp.float32),
        "wfc2": nrm(ks[7], (N_LAYER, 4 * N_EMBD, N_EMBD)),
        "bfc2": jnp.zeros((N_LAYER, 1, N_EMBD), jnp.float32),
        "ln1_g": (1.0 + 0.05 * jax.random.normal(ks[8], (N_LAYER, 1, N_EMBD))).astype(jnp.float32),
        "ln1_b": (0.05 * jax.random.normal(ks[9], (N_LAYER, 1, N_EMBD))).astype(jnp.float32),
        "ln2_g": (1.0 + 0.05 * jax.random.normal(ks[10], (N_LAYER, 1, N_EMBD))).astype(jnp.float32),
        "ln2_b": (0.05 * jax.random.normal(ks[11], (N_LAYER, 1, N_EMBD))).astype(jnp.float32),
        "lnf_g": (1.0 + 0.05 * jax.random.normal(ks[12], (1, N_EMBD))).astype(jnp.float32),
        "lnf_b": (0.05 * jax.random.normal(ks[13], (1, N_EMBD))).astype(jnp.float32),
        "wlm": nrm(ks[14], (N_EMBD, VOCAB_SIZE)),
        "blm": jnp.zeros((1, VOCAB_SIZE), jnp.float32),
    }

    # ---- kernel-layout parameters (built once at setup time) ----
    scale = HEAD_SIZE ** -0.5

    def stack_heads(w):  # (L, H, C, hs) -> (L, C, H*hs)
        return jnp.transpose(w, (0, 2, 1, 3)).reshape(N_LAYER, N_EMBD, N_HEAD * HEAD_SIZE)

    wqkv = jnp.concatenate(
        [stack_heads(params["wq"]) * scale,      # fold 1/sqrt(head_size) into Q weights
         stack_heads(params["wk"]),
         stack_heads(params["wv"])], axis=-1).astype(jnp.float32)            # (L, C, 3C)

    emb_pad = np.zeros((V_PAD, N_EMBD), np.float32)                          # row-padded vocab
    emb_pad[:VOCAB_SIZE] = np.asarray(params["tok_emb"])

    pos_tiled = np.tile(np.asarray(params["pos_emb"])[:T], (B, 1))           # (B*T, C)

    wlm_pad = np.zeros((N_EMBD, V_PAD), np.float32)                          # lane-padded lm_head
    wlm_pad[:, :VOCAB_SIZE] = np.asarray(params["wlm"])

    # packed LN gains/biases + matmul biases: (L+1, 8, 128) slab
    vec = np.zeros((N_LAYER + 1, 8, V_PAD), np.float32)
    vec[:N_LAYER, 0, :N_EMBD] = np.asarray(params["ln1_g"]).reshape(N_LAYER, N_EMBD)
    vec[:N_LAYER, 1, :N_EMBD] = np.asarray(params["ln1_b"]).reshape(N_LAYER, N_EMBD)
    vec[:N_LAYER, 2, :N_EMBD] = np.asarray(params["ln2_g"]).reshape(N_LAYER, N_EMBD)
    vec[:N_LAYER, 3, :N_EMBD] = np.asarray(params["ln2_b"]).reshape(N_LAYER, N_EMBD)
    vec[:N_LAYER, 4, :N_EMBD] = np.asarray(params["bproj"]).reshape(N_LAYER, N_EMBD)
    vec[:N_LAYER, 5, :N_EMBD] = np.asarray(params["bfc2"]).reshape(N_LAYER, N_EMBD)
    vec[:N_LAYER, 6, :4 * N_EMBD] = np.asarray(params["bfc1"]).reshape(N_LAYER, 4 * N_EMBD)
    vec[N_LAYER, 0, :N_EMBD] = np.asarray(params["lnf_g"]).reshape(N_EMBD)
    vec[N_LAYER, 1, :N_EMBD] = np.asarray(params["lnf_b"]).reshape(N_EMBD)
    vec[N_LAYER, 2, :VOCAB_SIZE] = np.asarray(params["blm"]).reshape(VOCAB_SIZE)

    kparams = {
        "emb_pad": jnp.asarray(emb_pad),
        "pos_tiled": jnp.asarray(pos_tiled),
        "wqkv": wqkv,
        "wproj": params["wproj"],
        "wfc1": params["wfc1"],
        "wfc2": params["wfc2"],
        "wlm_pad": jnp.asarray(wlm_pad),
        "vec": jnp.asarray(vec),
    }

    idx = jax.random.randint(ks[15], (B, T), 0, VOCAB_SIZE, dtype=jnp.int32)
    # padding mask: first 6 positions of every sequence are valid
    mask = jnp.broadcast_to(jnp.arange(T)[None, :] < 6, (B, T)).astype(jnp.float32)
    key_mask = mask.reshape(1, B * T)

    # TODO(synk): F.cross_entropy loss branch (targets) not implemented; logits only.
    logits_pad = jax.block_until_ready(gpt_forward(idx, key_mask, kparams))

    with jax.default_matmul_precision("highest"):
        ref = _reference_forward(idx, mask, params)

    logits = np.asarray(logits_pad).reshape(B, T, V_PAD)[:, :, :VOCAB_SIZE]
    # Kernel matmuls run at MXU-default (single bf16-pass) precision per the perf
    # review; the reference is f32 "highest", so the tolerance reflects bf16 rounding.
    np.testing.assert_allclose(logits, np.asarray(ref), rtol=2e-2, atol=1e-2)

    print("KERNEL_OK")
</pallas_src>

<mosaic_0001>
module attributes {stable_mosaic.version = 11 : i64} {
  func.func @_gpt_kernel(%arg0: i32, %arg1: memref<2x8xi32, #tpu.memory_space<vmem>>, %arg2: memref<1x16xf32, #tpu.memory_space<vmem>>, %arg3: memref<128x32xf32, #tpu.memory_space<vmem>>, %arg4: memref<16x32xf32, #tpu.memory_space<vmem>>, %arg5: memref<2x32x96xf32, #tpu.memory_space<vmem>>, %arg6: memref<2x32x32xf32, #tpu.memory_space<vmem>>, %arg7: memref<2x32x128xf32, #tpu.memory_space<vmem>>, %arg8: memref<2x128x32xf32, #tpu.memory_space<vmem>>, %arg9: memref<32x128xf32, #tpu.memory_space<vmem>>, %arg10: memref<3x8x128xf32, #tpu.memory_space<vmem>>, %arg11: memref<16x128xf32, #tpu.memory_space<vmem>>) attributes {dimension_semantics = [#tpu.dimension_semantics<arbitrary>], iteration_bounds = array<i64: 1>, scalar_prefetch = 0 : i64, scratch_operands = 0 : i64, tpu.core_type = #tpu.core_type<tc>, window_params = [{pipeline_mode = #tpu.pipeline_mode<synchronous>, transform_indices = @transform_0, window_bounds = array<i64: 2, 8>}, {pipeline_mode = #tpu.pipeline_mode<synchronous>, transform_indices = @transform_1, window_bounds = array<i64: 1, 16>}, {pipeline_mode = #tpu.pipeline_mode<synchronous>, transform_indices = @transform_2, window_bounds = array<i64: 128, 32>}, {pipeline_mode = #tpu.pipeline_mode<synchronous>, transform_indices = @transform_3, window_bounds = array<i64: 16, 32>}, {pipeline_mode = #tpu.pipeline_mode<synchronous>, transform_indices = @transform_4, window_bounds = array<i64: 2, 32, 96>}, {pipeline_mode = #tpu.pipeline_mode<synchronous>, transform_indices = @transform_5, window_bounds = array<i64: 2, 32, 32>}, {pipeline_mode = #tpu.pipeline_mode<synchronous>, transform_indices = @transform_6, window_bounds = array<i64: 2, 32, 128>}, {pipeline_mode = #tpu.pipeline_mode<synchronous>, transform_indices = @transform_7, window_bounds = array<i64: 2, 128, 32>}, {pipeline_mode = #tpu.pipeline_mode<synchronous>, transform_indices = @transform_8, window_bounds = array<i64: 32, 128>}, {pipeline_mode = #tpu.pipeline_mode<synchronous>, transform_indices = @transform_9, window_bounds = array<i64: 3, 8, 128>}, {pipeline_mode = #tpu.pipeline_mode<synchronous>, transform_indices = @transform_10, window_bounds = array<i64: 16, 128>}]} {
    %c0 = arith.constant 0 : index
    %c0_0 = arith.constant 0 : index
    %0 = vector.load %arg1[%c0, %c0_0] : memref<2x8xi32, #tpu.memory_space<vmem>>, vector<2x8xi32>
    %1 = tpu.iota {dimensions = array<i32: 2>} : vector<2x8x128xi32>
    %2 = vector.shape_cast %0 : vector<2x8xi32> to vector<2x8x1xi32>
    %3 = vector.broadcast %2 : vector<2x8x1xi32> to vector<2x8x128xi32>
    %4 = arith.cmpi eq, %1, %3 : vector<2x8x128xi32>
    %5 = arith.extui %4 : vector<2x8x128xi1> to vector<2x8x128xi32>
    %6 = arith.sitofp %5 : vector<2x8x128xi32> to vector<2x8x128xf32>
    %7 = vector.shape_cast %6 : vector<2x8x128xf32> to vector<16x128xf32>
    %c0_1 = arith.constant 0 : index
    %c0_2 = arith.constant 0 : index
    %8 = vector.load %arg3[%c0_1, %c0_2] : memref<128x32xf32, #tpu.memory_space<vmem>>, vector<128x32xf32>
    %cst = arith.constant dense<0.000000e+00> : vector<16x32xf32>
    %9 = tpu.matmul %7, %8, %cst {dimension_numbers = #tpu.dot_dimension_numbers<[1], [0], [0], [1], [0, 0, 1, 1], [], []>} : vector<16x128xf32>, vector<128x32xf32>, vector<16x32xf32> -> vector<16x32xf32>
    %c0_3 = arith.constant 0 : index
    %c0_4 = arith.constant 0 : index
    %10 = vector.load %arg4[%c0_3, %c0_4] : memref<16x32xf32, #tpu.memory_space<vmem>>, vector<16x32xf32>
    %11 = arith.addf %9, %10 : vector<16x32xf32>
    %12 = tpu.iota {dimensions = array<i32: 0>} : vector<16x16xi32>
    %13 = tpu.iota {dimensions = array<i32: 1>} : vector<16x16xi32>
    %c3_i32 = arith.constant 3 : i32
    %14 = vector.broadcast %c3_i32 : i32 to vector<16x16xi32>
    %15 = arith.shrsi %12, %14 : vector<16x16xi32>
    %c3_i32_5 = arith.constant 3 : i32
    %16 = vector.broadcast %c3_i32_5 : i32 to vector<16x16xi32>
    %17 = arith.shrsi %13, %16 : vector<16x16xi32>
    %18 = arith.cmpi eq, %15, %17 : vector<16x16xi32>
    %c7_i32 = arith.constant 7 : i32
    %19 = vector.broadcast %c7_i32 : i32 to vector<16x16xi32>
    %20 = arith.andi %13, %19 : vector<16x16xi32>
    %c7_i32_6 = arith.constant 7 : i32
    %21 = vector.broadcast %c7_i32_6 : i32 to vector<16x16xi32>
    %22 = arith.andi %12, %21 : vector<16x16xi32>
    %23 = arith.cmpi sle, %20, %22 : vector<16x16xi32>
    %c0_7 = arith.constant 0 : index
    %c0_8 = arith.constant 0 : index
    %24 = vector.load %arg2[%c0_7, %c0_8] : memref<1x16xf32, #tpu.memory_space<vmem>>, vector<1x16xf32>
    %cst_9 = arith.constant 5.000000e-01 : f32
    %25 = vector.broadcast %cst_9 : f32 to vector<1x16xf32>
    %26 = arith.cmpf ogt, %24, %25 : vector<1x16xf32>
    %27 = arith.andi %18, %23 : vector<16x16xi1>
    %28 = vector.broadcast %26 : vector<1x16xi1> to vector<16x16xi1>
    %29 = arith.andi %27, %28 : vector<16x16xi1>
    %cst_10 = arith.constant 0.000000e+00 : f32
    %cst_11 = arith.constant -1.000000e+30 : f32
    %30 = vector.broadcast %cst_10 : f32 to vector<16x16xf32>
    %31 = vector.broadcast %cst_11 : f32 to vector<16x16xf32>
    %32 = arith.select %29, %30, %31 : vector<16x16xi1>, vector<16x16xf32>
    %33 = tpu.concatenate %32, %32, %32, %32 in 0 : vector<16x16xf32>, vector<16x16xf32>, vector<16x16xf32>, vector<16x16xf32> -> vector<64x16xf32>
    %c0_12 = arith.constant 0 : index
    %c0_13 = arith.constant 0 : index
    %c0_14 = arith.constant 0 : index
    %34 = vector.load %arg10[%c0_12, %c0_13, %c0_14] : memref<3x8x128xf32, #tpu.memory_space<vmem>>, vector<1x8x128xf32>
    %35 = vector.shape_cast %34 : vector<1x8x128xf32> to vector<8x128xf32>
    %36 = vector.extract_strided_slice %35 {offsets = [0, 0], sizes = [1, 32], strides = [1, 1]} : vector<8x128xf32> to vector<1x32xf32>
    %37 = vector.extract_strided_slice %35 {offsets = [1, 0], sizes = [1, 32], strides = [1, 1]} : vector<8x128xf32> to vector<1x32xf32>
    %38 = vector.extract_strided_slice %35 {offsets = [2, 0], sizes = [1, 32], strides = [1, 1]} : vector<8x128xf32> to vector<1x32xf32>
    %39 = vector.extract_strided_slice %35 {offsets = [3, 0], sizes = [1, 32], strides = [1, 1]} : vector<8x128xf32> to vector<1x32xf32>
    %40 = vector.extract_strided_slice %35 {offsets = [4, 0], sizes = [1, 32], strides = [1, 1]} : vector<8x128xf32> to vector<1x32xf32>
    %41 = vector.extract_strided_slice %35 {offsets = [5, 0], sizes = [1, 32], strides = [1, 1]} : vector<8x128xf32> to vector<1x32xf32>
    %42 = vector.extract_strided_slice %35 {offsets = [6, 0], sizes = [1, 128], strides = [1, 1]} : vector<8x128xf32> to vector<1x128xf32>
    %cst_15 = arith.constant dense<0.000000e+00> : vector<16xf32>
    %43 = vector.multi_reduction <add>, %11, %cst_15 [1] : vector<16x32xf32> to vector<16xf32>
    %44 = vector.shape_cast %43 : vector<16xf32> to vector<16x1xf32>
    %cst_16 = arith.constant 3.200000e+01 : f32
    %45 = vector.broadcast %cst_16 : f32 to vector<16x1xf32>
    %46 = arith.divf %44, %45 : vector<16x1xf32>
    %47 = vector.broadcast %46 : vector<16x1xf32> to vector<16x32xf32>
    %48 = arith.subf %11, %47 : vector<16x32xf32>
    %49 = arith.mulf %48, %48 : vector<16x32xf32>
    %cst_17 = arith.constant dense<0.000000e+00> : vector<16xf32>
    %50 = vector.multi_reduction <add>, %49, %cst_17 [1] : vector<16x32xf32> to vector<16xf32>
    %51 = vector.shape_cast %50 : vector<16xf32> to vector<16x1xf32>
    %cst_18 = arith.constant 3.200000e+01 : f32
    %52 = vector.broadcast %cst_18 : f32 to vector<16x1xf32>
    %53 = arith.divf %51, %52 : vector<16x1xf32>
    %cst_19 = arith.constant 9.99999974E-6 : f32
    %54 = vector.broadcast %cst_19 : f32 to vector<16x1xf32>
    %55 = arith.addf %53, %54 : vector<16x1xf32>
    %56 = math.rsqrt %55 : vector<16x1xf32>
    %57 = vector.broadcast %56 : vector<16x1xf32> to vector<16x32xf32>
    %58 = arith.mulf %48, %57 : vector<16x32xf32>
    %59 = vector.broadcast %36 : vector<1x32xf32> to vector<16x32xf32>
    %60 = arith.mulf %58, %59 : vector<16x32xf32>
    %61 = vector.broadcast %37 : vector<1x32xf32> to vector<16x32xf32>
    %62 = arith.addf %60, %61 : vector<16x32xf32>
    %c0_20 = arith.constant 0 : index
    %c0_21 = arith.constant 0 : index
    %c0_22 = arith.constant 0 : index
    %63 = vector.load %arg5[%c0_20, %c0_21, %c0_22] : memref<2x32x96xf32, #tpu.memory_space<vmem>>, vector<1x32x96xf32>
    %64 = vector.shape_cast %63 : vector<1x32x96xf32> to vector<32x96xf32>
    %cst_23 = arith.constant dense<0.000000e+00> : vector<16x96xf32>
    %65 = tpu.matmul %62, %64, %cst_23 {dimension_numbers = #tpu.dot_dimension_numbers<[1], [0], [0], [1], [0, 0, 1, 1], [], []>} : vector<16x32xf32>, vector<32x96xf32>, vector<16x96xf32> -> vector<16x96xf32>
    %66 = vector.extract_strided_slice %65 {offsets = [0, 0], sizes = [16, 8], strides = [1, 1]} : vector<16x96xf32> to vector<16x8xf32>
    %67 = vector.extract_strided_slice %65 {offsets = [0, 32], sizes = [16, 8], strides = [1, 1]} : vector<16x96xf32> to vector<16x8xf32>
    %cst_24 = arith.constant dense<0.000000e+00> : vector<16x16xf32>
    %68 = tpu.matmul %66, %67, %cst_24 {dimension_numbers = #tpu.dot_dimension_numbers<[1], [1], [0], [0], [0, 0, 1, 0], [], []>} : vector<16x8xf32>, vector<16x8xf32>, vector<16x16xf32> -> vector<16x16xf32>
    %69 = vector.extract_strided_slice %65 {offsets = [0, 8], sizes = [16, 8], strides = [1, 1]} : vector<16x96xf32> to vector<16x8xf32>
    %70 = vector.extract_strided_slice %65 {offsets = [0, 40], sizes = [16, 8], strides = [1, 1]} : vector<16x96xf32> to vector<16x8xf32>
    %cst_25 = arith.constant dense<0.000000e+00> : vector<16x16xf32>
    %71 = tpu.matmul %69, %70, %cst_25 {dimension_numbers = #tpu.dot_dimension_numbers<[1], [1], [0], [0], [0, 0, 1, 0], [], []>} : vector<16x8xf32>, vector<16x8xf32>, vector<16x16xf32> -> vector<16x16xf32>
    %72 = vector.extract_strided_slice %65 {offsets = [0, 16], sizes = [16, 8], strides = [1, 1]} : vector<16x96xf32> to vector<16x8xf32>
    %73 = vector.extract_strided_slice %65 {offsets = [0, 48], sizes = [16, 8], strides = [1, 1]} : vector<16x96xf32> to vector<16x8xf32>
    %cst_26 = arith.constant dense<0.000000e+00> : vector<16x16xf32>
    %74 = tpu.matmul %72, %73, %cst_26 {dimension_numbers = #tpu.dot_dimension_numbers<[1], [1], [0], [0], [0, 0, 1, 0], [], []>} : vector<16x8xf32>, vector<16x8xf32>, vector<16x16xf32> -> vector<16x16xf32>
    %75 = vector.extract_strided_slice %65 {offsets = [0, 24], sizes = [16, 8], strides = [1, 1]} : vector<16x96xf32> to vector<16x8xf32>
    %76 = vector.extract_strided_slice %65 {offsets = [0, 56], sizes = [16, 8], strides = [1, 1]} : vector<16x96xf32> to vector<16x8xf32>
    %cst_27 = arith.constant dense<0.000000e+00> : vector<16x16xf32>
    %77 = tpu.matmul %75, %76, %cst_27 {dimension_numbers = #tpu.dot_dimension_numbers<[1], [1], [0], [0], [0, 0, 1, 0], [], []>} : vector<16x8xf32>, vector<16x8xf32>, vector<16x16xf32> -> vector<16x16xf32>
    %78 = tpu.concatenate %68, %71, %74, %77 in 0 : vector<16x16xf32>, vector<16x16xf32>, vector<16x16xf32>, vector<16x16xf32> -> vector<64x16xf32>
    %79 = arith.addf %78, %33 : vector<64x16xf32>
    %cst_28 = arith.constant dense<0xFF800000> : vector<64xf32>
    %80 = vector.multi_reduction <maximumf>, %79, %cst_28 [1] : vector<64x16xf32> to vector<64xf32>
    %81 = vector.shape_cast %80 : vector<64xf32> to vector<64x1xf32>
    %82 = vector.broadcast %81 : vector<64x1xf32> to vector<64x16xf32>
    %83 = arith.subf %79, %82 : vector<64x16xf32>
    %84 = math.exp %83 : vector<64x16xf32>
    %cst_29 = arith.constant dense<0.000000e+00> : vector<64xf32>
    %85 = vector.multi_reduction <add>, %84, %cst_29 [1] : vector<64x16xf32> to vector<64xf32>
    %86 = vector.shape_cast %85 : vector<64xf32> to vector<64x1xf32>
    %87 = vector.broadcast %86 : vector<64x1xf32> to vector<64x16xf32>
    %88 = arith.divf %84, %87 : vector<64x16xf32>
    %c0_30 = arith.constant 0 : index
    %c0_31 = arith.constant 0 : index
    %c0_32 = arith.constant 0 : index
    %89 = vector.load %arg6[%c0_30, %c0_31, %c0_32] : memref<2x32x32xf32, #tpu.memory_space<vmem>>, vector<1x32x32xf32>
    %90 = vector.shape_cast %89 : vector<1x32x32xf32> to vector<32x32xf32>
    %91 = vector.extract_strided_slice %88 {offsets = [0, 0], sizes = [16, 16], strides = [1, 1]} : vector<64x16xf32> to vector<16x16xf32>
    %92 = vector.extract_strided_slice %65 {offsets = [0, 64], sizes = [16, 8], strides = [1, 1]} : vector<16x96xf32> to vector<16x8xf32>
    %cst_33 = arith.constant dense<0.000000e+00> : vector<16x8xf32>
    %93 = tpu.matmul %91, %92, %cst_33 {dimension_numbers = #tpu.dot_dimension_numbers<[1], [0], [0], [1], [0, 0, 1, 1], [], []>} : vector<16x16xf32>, vector<16x8xf32>, vector<16x8xf32> -> vector<16x8xf32>
    %94 = vector.extract_strided_slice %90 {offsets = [0, 0], sizes = [8, 32], strides = [1, 1]} : vector<32x32xf32> to vector<8x32xf32>
    %cst_34 = arith.constant dense<0.000000e+00> : vector<16x32xf32>
    %95 = tpu.matmul %93, %94, %cst_34 {dimension_numbers = #tpu.dot_dimension_numbers<[1], [0], [0], [1], [0, 0, 1, 1], [], []>} : vector<16x8xf32>, vector<8x32xf32>, vector<16x32xf32> -> vector<16x32xf32>
    %96 = vector.extract_strided_slice %88 {offsets = [16, 0], sizes = [16, 16], strides = [1, 1]} : vector<64x16xf32> to vector<16x16xf32>
    %97 = vector.extract_strided_slice %65 {offsets = [0, 72], sizes = [16, 8], strides = [1, 1]} : vector<16x96xf32> to vector<16x8xf32>
    %cst_35 = arith.constant dense<0.000000e+00> : vector<16x8xf32>
    %98 = tpu.matmul %96, %97, %cst_35 {dimension_numbers = #tpu.dot_dimension_numbers<[1], [0], [0], [1], [0, 0, 1, 1], [], []>} : vector<16x16xf32>, vector<16x8xf32>, vector<16x8xf32> -> vector<16x8xf32>
    %99 = vector.extract_strided_slice %90 {offsets = [8, 0], sizes = [8, 32], strides = [1, 1]} : vector<32x32xf32> to vector<8x32xf32>
    %cst_36 = arith.constant dense<0.000000e+00> : vector<16x32xf32>
    %100 = tpu.matmul %98, %99, %cst_36 {dimension_numbers = #tpu.dot_dimension_numbers<[1], [0], [0], [1], [0, 0, 1, 1], [], []>} : vector<16x8xf32>, vector<8x32xf32>, vector<16x32xf32> -> vector<16x32xf32>
    %101 = arith.addf %95, %100 : vector<16x32xf32>
    %102 = vector.extract_strided_slice %88 {offsets = [32, 0], sizes = [16, 16], strides = [1, 1]} : vector<64x16xf32> to vector<16x16xf32>
    %103 = vector.extract_strided_slice %65 {offsets = [0, 80], sizes = [16, 8], strides = [1, 1]} : vector<16x96xf32> to vector<16x8xf32>
    %cst_37 = arith.constant dense<0.000000e+00> : vector<16x8xf32>
    %104 = tpu.matmul %102, %103, %cst_37 {dimension_numbers = #tpu.dot_dimension_numbers<[1], [0], [0], [1], [0, 0, 1, 1], [], []>} : vector<16x16xf32>, vector<16x8xf32>, vector<16x8xf32> -> vector<16x8xf32>
    %105 = vector.extract_strided_slice %90 {offsets = [16, 0], sizes = [8, 32], strides = [1, 1]} : vector<32x32xf32> to vector<8x32xf32>
    %cst_38 = arith.constant dense<0.000000e+00> : vector<16x32xf32>
    %106 = tpu.matmul %104, %105, %cst_38 {dimension_numbers = #tpu.dot_dimension_numbers<[1], [0], [0], [1], [0, 0, 1, 1], [], []>} : vector<16x8xf32>, vector<8x32xf32>, vector<16x32xf32> -> vector<16x32xf32>
    %107 = arith.addf %101, %106 : vector<16x32xf32>
    %108 = vector.extract_strided_slice %88 {offsets = [48, 0], sizes = [16, 16], strides = [1, 1]} : vector<64x16xf32> to vector<16x16xf32>
    %109 = vector.extract_strided_slice %65 {offsets = [0, 88], sizes = [16, 8], strides = [1, 1]} : vector<16x96xf32> to vector<16x8xf32>
    %cst_39 = arith.constant dense<0.000000e+00> : vector<16x8xf32>
    %110 = tpu.matmul %108, %109, %cst_39 {dimension_numbers = #tpu.dot_dimension_numbers<[1], [0], [0], [1], [0, 0, 1, 1], [], []>} : vector<16x16xf32>, vector<16x8xf32>, vector<16x8xf32> -> vector<16x8xf32>
    %111 = vector.extract_strided_slice %90 {offsets = [24, 0], sizes = [8, 32], strides = [1, 1]} : vector<32x32xf32> to vector<8x32xf32>
    %cst_40 = arith.constant dense<0.000000e+00> : vector<16x32xf32>
    %112 = tpu.matmul %110, %111, %cst_40 {dimension_numbers = #tpu.dot_dimension_numbers<[1], [0], [0], [1], [0, 0, 1, 1], [], []>} : vector<16x8xf32>, vector<8x32xf32>, vector<16x32xf32> -> vector<16x32xf32>
    %113 = arith.addf %107, %112 : vector<16x32xf32>
    %114 = arith.addf %11, %113 : vector<16x32xf32>
    %115 = vector.broadcast %40 : vector<1x32xf32> to vector<16x32xf32>
    %116 = arith.addf %114, %115 : vector<16x32xf32>
    %cst_41 = arith.constant dense<0.000000e+00> : vector<16xf32>
    %117 = vector.multi_reduction <add>, %116, %cst_41 [1] : vector<16x32xf32> to vector<16xf32>
    %118 = vector.shape_cast %117 : vector<16xf32> to vector<16x1xf32>
    %cst_42 = arith.constant 3.200000e+01 : f32
    %119 = vector.broadcast %cst_42 : f32 to vector<16x1xf32>
    %120 = arith.divf %118, %119 : vector<16x1xf32>
    %121 = vector.broadcast %120 : vector<16x1xf32> to vector<16x32xf32>
    %122 = arith.subf %116, %121 : vector<16x32xf32>
    %123 = arith.mulf %122, %122 : vector<16x32xf32>
    %cst_43 = arith.constant dense<0.000000e+00> : vector<16xf32>
    %124 = vector.multi_reduction <add>, %123, %cst_43 [1] : vector<16x32xf32> to vector<16xf32>
    %125 = vector.shape_cast %124 : vector<16xf32> to vector<16x1xf32>
    %cst_44 = arith.constant 3.200000e+01 : f32
    %126 = vector.broadcast %cst_44 : f32 to vector<16x1xf32>
    %127 = arith.divf %125, %126 : vector<16x1xf32>
    %cst_45 = arith.constant 9.99999974E-6 : f32
    %128 = vector.broadcast %cst_45 : f32 to vector<16x1xf32>
    %129 = arith.addf %127, %128 : vector<16x1xf32>
    %130 = math.rsqrt %129 : vector<16x1xf32>
    %131 = vector.broadcast %130 : vector<16x1xf32> to vector<16x32xf32>
    %132 = arith.mulf %122, %131 : vector<16x32xf32>
    %133 = vector.broadcast %38 : vector<1x32xf32> to vector<16x32xf32>
    %134 = arith.mulf %132, %133 : vector<16x32xf32>
    %135 = vector.broadcast %39 : vector<1x32xf32> to vector<16x32xf32>
    %136 = arith.addf %134, %135 : vector<16x32xf32>
    %c0_46 = arith.constant 0 : index
    %c0_47 = arith.constant 0 : index
    %c0_48 = arith.constant 0 : index
    %137 = vector.load %arg7[%c0_46, %c0_47, %c0_48] : memref<2x32x128xf32, #tpu.memory_space<vmem>>, vector<1x32x128xf32>
    %138 = vector.shape_cast %137 : vector<1x32x128xf32> to vector<32x128xf32>
    %cst_49 = arith.constant dense<0.000000e+00> : vector<16x128xf32>
    %139 = tpu.matmul %136, %138, %cst_49 {dimension_numbers = #tpu.dot_dimension_numbers<[1], [0], [0], [1], [0, 0, 1, 1], [], []>} : vector<16x32xf32>, vector<32x128xf32>, vector<16x128xf32> -> vector<16x128xf32>
    %140 = vector.broadcast %42 : vector<1x128xf32> to vector<16x128xf32>
    %141 = arith.addf %139, %140 : vector<16x128xf32>
    %cst_50 = arith.constant 0.000000e+00 : f32
    %142 = vector.broadcast %cst_50 : f32 to vector<16x128xf32>
    %143 = arith.maximumf %141, %142 : vector<16x128xf32>
    %c0_51 = arith.constant 0 : index
    %c0_52 = arith.constant 0 : index
    %c0_53 = arith.constant 0 : index
    %144 = vector.load %arg8[%c0_51, %c0_52, %c0_53] : memref<2x128x32xf32, #tpu.memory_space<vmem>>, vector<1x128x32xf32>
    %145 = vector.shape_cast %144 : vector<1x128x32xf32> to vector<128x32xf32>
    %cst_54 = arith.constant dense<0.000000e+00> : vector<16x32xf32>
    %146 = tpu.matmul %143, %145, %cst_54 {dimension_numbers = #tpu.dot_dimension_numbers<[1], [0], [0], [1], [0, 0, 1, 1], [], []>} : vector<16x128xf32>, vector<128x32xf32>, vector<16x32xf32> -> vector<16x32xf32>
    %147 = arith.addf %116, %146 : vector<16x32xf32>
    %148 = vector.broadcast %41 : vector<1x32xf32> to vector<16x32xf32>
    %149 = arith.addf %147, %148 : vector<16x32xf32>
    %c1 = arith.constant 1 : index
    %c0_55 = arith.constant 0 : index
    %c0_56 = arith.constant 0 : index
    %150 = vector.load %arg10[%c1, %c0_55, %c0_56] : memref<3x8x128xf32, #tpu.memory_space<vmem>>, vector<1x8x128xf32>
    %151 = vector.shape_cast %150 : vector<1x8x128xf32> to vector<8x128xf32>
    %152 = vector.extract_strided_slice %151 {offsets = [0, 0], sizes = [1, 32], strides = [1, 1]} : vector<8x128xf32> to vector<1x32xf32>
    %153 = vector.extract_strided_slice %151 {offsets = [1, 0], sizes = [1, 32], strides = [1, 1]} : vector<8x128xf32> to vector<1x32xf32>
    %154 = vector.extract_strided_slice %151 {offsets = [2, 0], sizes = [1, 32], strides = [1, 1]} : vector<8x128xf32> to vector<1x32xf32>
    %155 = vector.extract_strided_slice %151 {offsets = [3, 0], sizes = [1, 32], strides = [1, 1]} : vector<8x128xf32> to vector<1x32xf32>
    %156 = vector.extract_strided_slice %151 {offsets = [4, 0], sizes = [1, 32], strides = [1, 1]} : vector<8x128xf32> to vector<1x32xf32>
    %157 = vector.extract_strided_slice %151 {offsets = [5, 0], sizes = [1, 32], strides = [1, 1]} : vector<8x128xf32> to vector<1x32xf32>
    %158 = vector.extract_strided_slice %151 {offsets = [6, 0], sizes = [1, 128], strides = [1, 1]} : vector<8x128xf32> to vector<1x128xf32>
    %cst_57 = arith.constant dense<0.000000e+00> : vector<16xf32>
    %159 = vector.multi_reduction <add>, %149, %cst_57 [1] : vector<16x32xf32> to vector<16xf32>
    %160 = vector.shape_cast %159 : vector<16xf32> to vector<16x1xf32>
    %cst_58 = arith.constant 3.200000e+01 : f32
    %161 = vector.broadcast %cst_58 : f32 to vector<16x1xf32>
    %162 = arith.divf %160, %161 : vector<16x1xf32>
    %163 = vector.broadcast %162 : vector<16x1xf32> to vector<16x32xf32>
    %164 = arith.subf %149, %163 : vector<16x32xf32>
    %165 = arith.mulf %164, %164 : vector<16x32xf32>
    %cst_59 = arith.constant dense<0.000000e+00> : vector<16xf32>
    %166 = vector.multi_reduction <add>, %165, %cst_59 [1] : vector<16x32xf32> to vector<16xf32>
    %167 = vector.shape_cast %166 : vector<16xf32> to vector<16x1xf32>
    %cst_60 = arith.constant 3.200000e+01 : f32
    %168 = vector.broadcast %cst_60 : f32 to vector<16x1xf32>
    %169 = arith.divf %167, %168 : vector<16x1xf32>
    %cst_61 = arith.constant 9.99999974E-6 : f32
    %170 = vector.broadcast %cst_61 : f32 to vector<16x1xf32>
    %171 = arith.addf %169, %170 : vector<16x1xf32>
    %172 = math.rsqrt %171 : vector<16x1xf32>
    %173 = vector.broadcast %172 : vector<16x1xf32> to vector<16x32xf32>
    %174 = arith.mulf %164, %173 : vector<16x32xf32>
    %175 = vector.broadcast %152 : vector<1x32xf32> to vector<16x32xf32>
    %176 = arith.mulf %174, %175 : vector<16x32xf32>
    %177 = vector.broadcast %153 : vector<1x32xf32> to vector<16x32xf32>
    %178 = arith.addf %176, %177 : vector<16x32xf32>
    %c1_62 = arith.constant 1 : index
    %c0_63 = arith.constant 0 : index
    %c0_64 = arith.constant 0 : index
    %179 = vector.load %arg5[%c1_62, %c0_63, %c0_64] : memref<2x32x96xf32, #tpu.memory_space<vmem>>, vector<1x32x96xf32>
    %180 = vector.shape_cast %179 : vector<1x32x96xf32> to vector<32x96xf32>
    %cst_65 = arith.constant dense<0.000000e+00> : vector<16x96xf32>
    %181 = tpu.matmul %178, %180, %cst_65 {dimension_numbers = #tpu.dot_dimension_numbers<[1], [0], [0], [1], [0, 0, 1, 1], [], []>} : vector<16x32xf32>, vector<32x96xf32>, vector<16x96xf32> -> vector<16x96xf32>
    %182 = vector.extract_strided_slice %181 {offsets = [0, 0], sizes = [16, 8], strides = [1, 1]} : vector<16x96xf32> to vector<16x8xf32>
    %183 = vector.extract_strided_slice %181 {offsets = [0, 32], sizes = [16, 8], strides = [1, 1]} : vector<16x96xf32> to vector<16x8xf32>
    %cst_66 = arith.constant dense<0.000000e+00> : vector<16x16xf32>
    %184 = tpu.matmul %182, %183, %cst_66 {dimension_numbers = #tpu.dot_dimension_numbers<[1], [1], [0], [0], [0, 0, 1, 0], [], []>} : vector<16x8xf32>, vector<16x8xf32>, vector<16x16xf32> -> vector<16x16xf32>
    %185 = vector.extract_strided_slice %181 {offsets = [0, 8], sizes = [16, 8], strides = [1, 1]} : vector<16x96xf32> to vector<16x8xf32>
    %186 = vector.extract_strided_slice %181 {offsets = [0, 40], sizes = [16, 8], strides = [1, 1]} : vector<16x96xf32> to vector<16x8xf32>
    %cst_67 = arith.constant dense<0.000000e+00> : vector<16x16xf32>
    %187 = tpu.matmul %185, %186, %cst_67 {dimension_numbers = #tpu.dot_dimension_numbers<[1], [1], [0], [0], [0, 0, 1, 0], [], []>} : vector<16x8xf32>, vector<16x8xf32>, vector<16x16xf32> -> vector<16x16xf32>
    %188 = vector.extract_strided_slice %181 {offsets = [0, 16], sizes = [16, 8], strides = [1, 1]} : vector<16x96xf32> to vector<16x8xf32>
    %189 = vector.extract_strided_slice %181 {offsets = [0, 48], sizes = [16, 8], strides = [1, 1]} : vector<16x96xf32> to vector<16x8xf32>
    %cst_68 = arith.constant dense<0.000000e+00> : vector<16x16xf32>
    %190 = tpu.matmul %188, %189, %cst_68 {dimension_numbers = #tpu.dot_dimension_numbers<[1], [1], [0], [0], [0, 0, 1, 0], [], []>} : vector<16x8xf32>, vector<16x8xf32>, vector<16x16xf32> -> vector<16x16xf32>
    %191 = vector.extract_strided_slice %181 {offsets = [0, 24], sizes = [16, 8], strides = [1, 1]} : vector<16x96xf32> to vector<16x8xf32>
    %192 = vector.extract_strided_slice %181 {offsets = [0, 56], sizes = [16, 8], strides = [1, 1]} : vector<16x96xf32> to vector<16x8xf32>
    %cst_69 = arith.constant dense<0.000000e+00> : vector<16x16xf32>
    %193 = tpu.matmul %191, %192, %cst_69 {dimension_numbers = #tpu.dot_dimension_numbers<[1], [1], [0], [0], [0, 0, 1, 0], [], []>} : vector<16x8xf32>, vector<16x8xf32>, vector<16x16xf32> -> vector<16x16xf32>
    %194 = tpu.concatenate %184, %187, %190, %193 in 0 : vector<16x16xf32>, vector<16x16xf32>, vector<16x16xf32>, vector<16x16xf32> -> vector<64x16xf32>
    %195 = arith.addf %194, %33 : vector<64x16xf32>
    %cst_70 = arith.constant dense<0xFF800000> : vector<64xf32>
    %196 = vector.multi_reduction <maximumf>, %195, %cst_70 [1] : vector<64x16xf32> to vector<64xf32>
    %197 = vector.shape_cast %196 : vector<64xf32> to vector<64x1xf32>
    %198 = vector.broadcast %197 : vector<64x1xf32> to vector<64x16xf32>
    %199 = arith.subf %195, %198 : vector<64x16xf32>
    %200 = math.exp %199 : vector<64x16xf32>
    %cst_71 = arith.constant dense<0.000000e+00> : vector<64xf32>
    %201 = vector.multi_reduction <add>, %200, %cst_71 [1] : vector<64x16xf32> to vector<64xf32>
    %202 = vector.shape_cast %201 : vector<64xf32> to vector<64x1xf32>
    %203 = vector.broadcast %202 : vector<64x1xf32> to vector<64x16xf32>
    %204 = arith.divf %200, %203 : vector<64x16xf32>
    %c1_72 = arith.constant 1 : index
    %c0_73 = arith.constant 0 : index
    %c0_74 = arith.constant 0 : index
    %205 = vector.load %arg6[%c1_72, %c0_73, %c0_74] : memref<2x32x32xf32, #tpu.memory_space<vmem>>, vector<1x32x32xf32>
    %206 = vector.shape_cast %205 : vector<1x32x32xf32> to vector<32x32xf32>
    %207 = vector.extract_strided_slice %204 {offsets = [0, 0], sizes = [16, 16], strides = [1, 1]} : vector<64x16xf32> to vector<16x16xf32>
    %208 = vector.extract_strided_slice %181 {offsets = [0, 64], sizes = [16, 8], strides = [1, 1]} : vector<16x96xf32> to vector<16x8xf32>
    %cst_75 = arith.constant dense<0.000000e+00> : vector<16x8xf32>
    %209 = tpu.matmul %207, %208, %cst_75 {dimension_numbers = #tpu.dot_dimension_numbers<[1], [0], [0], [1], [0, 0, 1, 1], [], []>} : vector<16x16xf32>, vector<16x8xf32>, vector<16x8xf32> -> vector<16x8xf32>
    %210 = vector.extract_strided_slice %206 {offsets = [0, 0], sizes = [8, 32], strides = [1, 1]} : vector<32x32xf32> to vector<8x32xf32>
    %cst_76 = arith.constant dense<0.000000e+00> : vector<16x32xf32>
    %211 = tpu.matmul %209, %210, %cst_76 {dimension_numbers = #tpu.dot_dimension_numbers<[1], [0], [0], [1], [0, 0, 1, 1], [], []>} : vector<16x8xf32>, vector<8x32xf32>, vector<16x32xf32> -> vector<16x32xf32>
    %212 = vector.extract_strided_slice %204 {offsets = [16, 0], sizes = [16, 16], strides = [1, 1]} : vector<64x16xf32> to vector<16x16xf32>
    %213 = vector.extract_strided_slice %181 {offsets = [0, 72], sizes = [16, 8], strides = [1, 1]} : vector<16x96xf32> to vector<16x8xf32>
    %cst_77 = arith.constant dense<0.000000e+00> : vector<16x8xf32>
    %214 = tpu.matmul %212, %213, %cst_77 {dimension_numbers = #tpu.dot_dimension_numbers<[1], [0], [0], [1], [0, 0, 1, 1], [], []>} : vector<16x16xf32>, vector<16x8xf32>, vector<16x8xf32> -> vector<16x8xf32>
    %215 = vector.extract_strided_slice %206 {offsets = [8, 0], sizes = [8, 32], strides = [1, 1]} : vector<32x32xf32> to vector<8x32xf32>
    %cst_78 = arith.constant dense<0.000000e+00> : vector<16x32xf32>
    %216 = tpu.matmul %214, %215, %cst_78 {dimension_numbers = #tpu.dot_dimension_numbers<[1], [0], [0], [1], [0, 0, 1, 1], [], []>} : vector<16x8xf32>, vector<8x32xf32>, vector<16x32xf32> -> vector<16x32xf32>
    %217 = arith.addf %211, %216 : vector<16x32xf32>
    %218 = vector.extract_strided_slice %204 {offsets = [32, 0], sizes = [16, 16], strides = [1, 1]} : vector<64x16xf32> to vector<16x16xf32>
    %219 = vector.extract_strided_slice %181 {offsets = [0, 80], sizes = [16, 8], strides = [1, 1]} : vector<16x96xf32> to vector<16x8xf32>
    %cst_79 = arith.constant dense<0.000000e+00> : vector<16x8xf32>
    %220 = tpu.matmul %218, %219, %cst_79 {dimension_numbers = #tpu.dot_dimension_numbers<[1], [0], [0], [1], [0, 0, 1, 1], [], []>} : vector<16x16xf32>, vector<16x8xf32>, vector<16x8xf32> -> vector<16x8xf32>
    %221 = vector.extract_strided_slice %206 {offsets = [16, 0], sizes = [8, 32], strides = [1, 1]} : vector<32x32xf32> to vector<8x32xf32>
    %cst_80 = arith.constant dense<0.000000e+00> : vector<16x32xf32>
    %222 = tpu.matmul %220, %221, %cst_80 {dimension_numbers = #tpu.dot_dimension_numbers<[1], [0], [0], [1], [0, 0, 1, 1], [], []>} : vector<16x8xf32>, vector<8x32xf32>, vector<16x32xf32> -> vector<16x32xf32>
    %223 = arith.addf %217, %222 : vector<16x32xf32>
    %224 = vector.extract_strided_slice %204 {offsets = [48, 0], sizes = [16, 16], strides = [1, 1]} : vector<64x16xf32> to vector<16x16xf32>
    %225 = vector.extract_strided_slice %181 {offsets = [0, 88], sizes = [16, 8], strides = [1, 1]} : vector<16x96xf32> to vector<16x8xf32>
    %cst_81 = arith.constant dense<0.000000e+00> : vector<16x8xf32>
    %226 = tpu.matmul %224, %225, %cst_81 {dimension_numbers = #tpu.dot_dimension_numbers<[1], [0], [0], [1], [0, 0, 1, 1], [], []>} : vector<16x16xf32>, vector<16x8xf32>, vector<16x8xf32> -> vector<16x8xf32>
    %227 = vector.extract_strided_slice %206 {offsets = [24, 0], sizes = [8, 32], strides = [1, 1]} : vector<32x32xf32> to vector<8x32xf32>
    %cst_82 = arith.constant dense<0.000000e+00> : vector<16x32xf32>
    %228 = tpu.matmul %226, %227, %cst_82 {dimension_numbers = #tpu.dot_dimension_numbers<[1], [0], [0], [1], [0, 0, 1, 1], [], []>} : vector<16x8xf32>, vector<8x32xf32>, vector<16x32xf32> -> vector<16x32xf32>
    %229 = arith.addf %223, %228 : vector<16x32xf32>
    %230 = arith.addf %149, %229 : vector<16x32xf32>
    %231 = vector.broadcast %156 : vector<1x32xf32> to vector<16x32xf32>
    %232 = arith.addf %230, %231 : vector<16x32xf32>
    %cst_83 = arith.constant dense<0.000000e+00> : vector<16xf32>
    %233 = vector.multi_reduction <add>, %232, %cst_83 [1] : vector<16x32xf32> to vector<16xf32>
    %234 = vector.shape_cast %233 : vector<16xf32> to vector<16x1xf32>
    %cst_84 = arith.constant 3.200000e+01 : f32
    %235 = vector.broadcast %cst_84 : f32 to vector<16x1xf32>
    %236 = arith.divf %234, %235 : vector<16x1xf32>
    %237 = vector.broadcast %236 : vector<16x1xf32> to vector<16x32xf32>
    %238 = arith.subf %232, %237 : vector<16x32xf32>
    %239 = arith.mulf %238, %238 : vector<16x32xf32>
    %cst_85 = arith.constant dense<0.000000e+00> : vector<16xf32>
    %240 = vector.multi_reduction <add>, %239, %cst_85 [1] : vector<16x32xf32> to vector<16xf32>
    %241 = vector.shape_cast %240 : vector<16xf32> to vector<16x1xf32>
    %cst_86 = arith.constant 3.200000e+01 : f32
    %242 = vector.broadcast %cst_86 : f32 to vector<16x1xf32>
    %243 = arith.divf %241, %242 : vector<16x1xf32>
    %cst_87 = arith.constant 9.99999974E-6 : f32
    %244 = vector.broadcast %cst_87 : f32 to vector<16x1xf32>
    %245 = arith.addf %243, %244 : vector<16x1xf32>
    %246 = math.rsqrt %245 : vector<16x1xf32>
    %247 = vector.broadcast %246 : vector<16x1xf32> to vector<16x32xf32>
    %248 = arith.mulf %238, %247 : vector<16x32xf32>
    %249 = vector.broadcast %154 : vector<1x32xf32> to vector<16x32xf32>
    %250 = arith.mulf %248, %249 : vector<16x32xf32>
    %251 = vector.broadcast %155 : vector<1x32xf32> to vector<16x32xf32>
    %252 = arith.addf %250, %251 : vector<16x32xf32>
    %c1_88 = arith.constant 1 : index
    %c0_89 = arith.constant 0 : index
    %c0_90 = arith.constant 0 : index
    %253 = vector.load %arg7[%c1_88, %c0_89, %c0_90] : memref<2x32x128xf32, #tpu.memory_space<vmem>>, vector<1x32x128xf32>
    %254 = vector.shape_cast %253 : vector<1x32x128xf32> to vector<32x128xf32>
    %cst_91 = arith.constant dense<0.000000e+00> : vector<16x128xf32>
    %255 = tpu.matmul %252, %254, %cst_91 {dimension_numbers = #tpu.dot_dimension_numbers<[1], [0], [0], [1], [0, 0, 1, 1], [], []>} : vector<16x32xf32>, vector<32x128xf32>, vector<16x128xf32> -> vector<16x128xf32>
    %256 = vector.broadcast %158 : vector<1x128xf32> to vector<16x128xf32>
    %257 = arith.addf %255, %256 : vector<16x128xf32>
    %cst_92 = arith.constant 0.000000e+00 : f32
    %258 = vector.broadcast %cst_92 : f32 to vector<16x128xf32>
    %259 = arith.maximumf %257, %258 : vector<16x128xf32>
    %c1_93 = arith.constant 1 : index
    %c0_94 = arith.constant 0 : index
    %c0_95 = arith.constant 0 : index
    %260 = vector.load %arg8[%c1_93, %c0_94, %c0_95] : memref<2x128x32xf32, #tpu.memory_space<vmem>>, vector<1x128x32xf32>
    %261 = vector.shape_cast %260 : vector<1x128x32xf32> to vector<128x32xf32>
    %cst_96 = arith.constant dense<0.000000e+00> : vector<16x32xf32>
    %262 = tpu.matmul %259, %261, %cst_96 {dimension_numbers = #tpu.dot_dimension_numbers<[1], [0], [0], [1], [0, 0, 1, 1], [], []>} : vector<16x128xf32>, vector<128x32xf32>, vector<16x32xf32> -> vector<16x32xf32>
    %263 = arith.addf %232, %262 : vector<16x32xf32>
    %264 = vector.broadcast %157 : vector<1x32xf32> to vector<16x32xf32>
    %265 = arith.addf %263, %264 : vector<16x32xf32>
    %c2 = arith.constant 2 : index
    %c0_97 = arith.constant 0 : index
    %c0_98 = arith.constant 0 : index
    %266 = vector.load %arg10[%c2, %c0_97, %c0_98] : memref<3x8x128xf32, #tpu.memory_space<vmem>>, vector<1x8x128xf32>
    %267 = vector.shape_cast %266 : vector<1x8x128xf32> to vector<8x128xf32>
    %268 = vector.extract_strided_slice %267 {offsets = [0, 0], sizes = [1, 32], strides = [1, 1]} : vector<8x128xf32> to vector<1x32xf32>
    %269 = vector.extract_strided_slice %267 {offsets = [1, 0], sizes = [1, 32], strides = [1, 1]} : vector<8x128xf32> to vector<1x32xf32>
    %270 = vector.extract_strided_slice %267 {offsets = [2, 0], sizes = [1, 128], strides = [1, 1]} : vector<8x128xf32> to vector<1x128xf32>
    %cst_99 = arith.constant dense<0.000000e+00> : vector<16xf32>
    %271 = vector.multi_reduction <add>, %265, %cst_99 [1] : vector<16x32xf32> to vector<16xf32>
    %272 = vector.shape_cast %271 : vector<16xf32> to vector<16x1xf32>
    %cst_100 = arith.constant 3.200000e+01 : f32
    %273 = vector.broadcast %cst_100 : f32 to vector<16x1xf32>
    %274 = arith.divf %272, %273 : vector<16x1xf32>
    %275 = vector.broadcast %274 : vector<16x1xf32> to vector<16x32xf32>
    %276 = arith.subf %265, %275 : vector<16x32xf32>
    %277 = arith.mulf %276, %276 : vector<16x32xf32>
    %cst_101 = arith.constant dense<0.000000e+00> : vector<16xf32>
    %278 = vector.multi_reduction <add>, %277, %cst_101 [1] : vector<16x32xf32> to vector<16xf32>
    %279 = vector.shape_cast %278 : vector<16xf32> to vector<16x1xf32>
    %cst_102 = arith.constant 3.200000e+01 : f32
    %280 = vector.broadcast %cst_102 : f32 to vector<16x1xf32>
    %281 = arith.divf %279, %280 : vector<16x1xf32>
    %cst_103 = arith.constant 9.99999974E-6 : f32
    %282 = vector.broadcast %cst_103 : f32 to vector<16x1xf32>
    %283 = arith.addf %281, %282 : vector<16x1xf32>
    %284 = math.rsqrt %283 : vector<16x1xf32>
    %285 = vector.broadcast %284 : vector<16x1xf32> to vector<16x32xf32>
    %286 = arith.mulf %276, %285 : vector<16x32xf32>
    %287 = vector.broadcast %268 : vector<1x32xf32> to vector<16x32xf32>
    %288 = arith.mulf %286, %287 : vector<16x32xf32>
    %289 = vector.broadcast %269 : vector<1x32xf32> to vector<16x32xf32>
    %290 = arith.addf %288, %289 : vector<16x32xf32>
    %c0_104 = arith.constant 0 : index
    %c0_105 = arith.constant 0 : index
    %291 = vector.load %arg9[%c0_104, %c0_105] : memref<32x128xf32, #tpu.memory_space<vmem>>, vector<32x128xf32>
    %cst_106 = arith.constant dense<0.000000e+00> : vector<16x128xf32>
    %292 = tpu.matmul %290, %291, %cst_106 {dimension_numbers = #tpu.dot_dimension_numbers<[1], [0], [0], [1], [0, 0, 1, 1], [], []>} : vector<16x32xf32>, vector<32x128xf32>, vector<16x128xf32> -> vector<16x128xf32>
    %293 = vector.broadcast %270 : vector<1x128xf32> to vector<16x128xf32>
    %294 = arith.addf %292, %293 : vector<16x128xf32>
    %c0_107 = arith.constant 0 : index
    %c0_108 = arith.constant 0 : index
    %295 = vector.load %arg11[%c0_107, %c0_108] : memref<16x128xf32, #tpu.memory_space<vmem>>, vector<16x128xf32>
    tpu.vector_store %arg11[%c0_107, %c0_108], %294 {strides = array<i32>} : memref<16x128xf32, #tpu.memory_space<vmem>>, vector<16x128xf32>,
    return
  }
  func.func @transform_0(%arg0: i32) -> (i32, i32) {
    %c0_i32 = arith.constant 0 : i32
    %c0_i32_0 = arith.constant 0 : i32
    %c0_i32_1 = arith.constant 0 : i32
    return %c0_i32, %c0_i32_0 : i32, i32
  }
  func.func @transform_1(%arg0: i32) -> (i32, i32) {
    %c0_i32 = arith.constant 0 : i32
    %c0_i32_0 = arith.constant 0 : i32
    %c0_i32_1 = arith.constant 0 : i32
    return %c0_i32, %c0_i32_0 : i32, i32
  }
  func.func @transform_2(%arg0: i32) -> (i32, i32) {
    %c0_i32 = arith.constant 0 : i32
    %c0_i32_0 = arith.constant 0 : i32
    %c0_i32_1 = arith.constant 0 : i32
    return %c0_i32, %c0_i32_0 : i32, i32
  }
  func.func @transform_3(%arg0: i32) -> (i32, i32) {
    %c0_i32 = arith.constant 0 : i32
    %c0_i32_0 = arith.constant 0 : i32
    %c0_i32_1 = arith.constant 0 : i32
    return %c0_i32, %c0_i32_0 : i32, i32
  }
  func.func @transform_4(%arg0: i32) -> (i32, i32, i32) {
    %c0_i32 = arith.constant 0 : i32
    %c0_i32_0 = arith.constant 0 : i32
    %c0_i32_1 = arith.constant 0 : i32
    %c0_i32_2 = arith.constant 0 : i32
    return %c0_i32, %c0_i32_0, %c0_i32_1 : i32, i32, i32
  }
  func.func @transform_5(%arg0: i32) -> (i32, i32, i32) {
    %c0_i32 = arith.constant 0 : i32
    %c0_i32_0 = arith.constant 0 : i32
    %c0_i32_1 = arith.constant 0 : i32
    %c0_i32_2 = arith.constant 0 : i32
    return %c0_i32, %c0_i32_0, %c0_i32_1 : i32, i32, i32
  }
  func.func @transform_6(%arg0: i32) -> (i32, i32, i32) {
    %c0_i32 = arith.constant 0 : i32
    %c0_i32_0 = arith.constant 0 : i32
    %c0_i32_1 = arith.constant 0 : i32
    %c0_i32_2 = arith.constant 0 : i32
    return %c0_i32, %c0_i32_0, %c0_i32_1 : i32, i32, i32
  }
  func.func @transform_7(%arg0: i32) -> (i32, i32, i32) {
    %c0_i32 = arith.constant 0 : i32
    %c0_i32_0 = arith.constant 0 : i32
    %c0_i32_1 = arith.constant 0 : i32
    %c0_i32_2 = arith.constant 0 : i32
    return %c0_i32, %c0_i32_0, %c0_i32_1 : i32, i32, i32
  }
  func.func @transform_8(%arg0: i32) -> (i32, i32) {
    %c0_i32 = arith.constant 0 : i32
    %c0_i32_0 = arith.constant 0 : i32
    %c0_i32_1 = arith.constant 0 : i32
    return %c0_i32, %c0_i32_0 : i32, i32
  }
  func.func @transform_9(%arg0: i32) -> (i32, i32, i32) {
    %c0_i32 = arith.constant 0 : i32
    %c0_i32_0 = arith.constant 0 : i32
    %c0_i32_1 = arith.constant 0 : i32
    %c0_i32_2 = arith.constant 0 : i32
    return %c0_i32, %c0_i32_0, %c0_i32_1 : i32, i32, i32
  }
  func.func @transform_10(%arg0: i32) -> (i32, i32) {
    %c0_i32 = arith.constant 0 : i32
    %c0_i32_0 = arith.constant 0 : i32
    %c0_i32_1 = arith.constant 0 : i32
    return %c0_i32, %c0_i32_0 : i32, i32
  }
}

</mosaic_0001>

<bundles_post_ra>
// kernel: gpt_forward.1
= control target key start
LH: loop header
LB: loop body
LE: loop exit
PB: predicated region body
PF: predicated region fallthrough
CT: control target
= control target key end

     0   :  { %v37_v0 = vlaneseq  ;;  %s5055_s0 = inlined_call_operand.vmem [shape: s32[2,8], index: 0, kind: input, shape index: {}]   ;;  %s5056_s1 = inlined_call_operand.vmem [shape: f32[1,16], index: 1, kind: input, shape index: {}]   ;;  %s5057_s2 = inlined_call_operand.vmem [shape: f32[128,32], index: 2, kind: input, shape index: {}]   ;;  %s5058_s3 = inlined_call_operand.vmem [shape: f32[16,32], index: 3, kind: input, shape index: {}]   ;;  %s5059_s4 = inlined_call_operand.vmem [shape: f32[2,32,96], index: 4, kind: input, shape index: {}]   ;;  %s5060_s5 = inlined_call_operand.vmem [shape: f32[2,32,32], index: 5, kind: input, shape index: {}]   ;;  %s5061_s6 = inlined_call_operand.vmem [shape: f32[2,32,128], index: 6, kind: input, shape index: {}]   ;;  %s5062_s7 = inlined_call_operand.vmem [shape: f32[2,128,32], index: 7, kind: input, shape index: {}]   ;;  %s5063_s8 = inlined_call_operand.vmem [shape: f32[32,128], index: 8, kind: input, shape index: {}]   ;;  %s5064_s9 = inlined_call_operand.vmem [shape: f32[3,8,128], index: 9, kind: input, shape index: {}]   ;;  %s5065_s10 = inlined_call_operand.hbm [shape: f32[16,128], index: 10, kind: output, shape index: {}]  }
   0x1   :  { %v59_v1 = vld [vmem:[%s5057_s2] sm:$0xff]  ;;  %v60_v2 = vld [vmem:[%s5057_s2 + $0x8] sm:$0xff]  ;;  %v61_v4 = vld [vmem:[%s5057_s2 + $0x10] sm:$0xff] }
   0x2   :  { %v3923_v3 = vpack.c.bf16 %v60_v2, %v59_v1  ;;  %v62_v5 = vld [vmem:[%s5057_s2 + $0x18] sm:$0xff]  ;;  %v4440_v6 = vshrl.u32 %v37_v0, 7  ;;  %v63_v8 = vld [vmem:[%s5057_s2 + $0x20] sm:$0xff]  ;;  %v64_v9 = vld [vmem:[%s5057_s2 + $0x28] sm:$0xff] }
   0x3   :  { %v3927_v7 = vpack.c.bf16 %v62_v5, %v61_v4  ;;  %v36_v10 = vld [vmem:[%s5055_s0] sm:$0x3]  ;;  %v3931_v13 = vpack.c.bf16 %v64_v9, %v63_v8  ;;  %v65_v15 = vld [vmem:[%s5057_s2 + $0x30] sm:$0xff]  ;;  %v66_v16 = vld [vmem:[%s5057_s2 + $0x38] sm:$0xff] }
   0x4   :  { %3924 = vmatprep.subr.bf16.mxu0 %v3923_v3  ;;  %v4452_v11 = vsub.s32 0, %v4440_v6  ;;  %v4455_v12 = vsub.s32 1, %v4440_v6 }
   0x5   :  { %3926 = vmatpush3.bf16.msra.mxu0 %v3923_v3 }
   0x6   :  { %3928 = vmatprep.subr.bf16.mxu0 %v3927_v7  ;;  %v42_v14 = vrot.slane %v36_v10, %v4452_v11 }
   0x7   :  { %15 = vsyncpa [#allocation3], 0  ;;  %v49_v17 = vrot.slane %v36_v10, %v4455_v12  ;;  %v3935_v18 = vpack.c.bf16 %v66_v16, %v65_v15  ;;  %v67_v19 = vld [vmem:[%s5057_s2 + $0x40] sm:$0xff]  ;;  %v68_v20 = vld [vmem:[%s5057_s2 + $0x48] sm:$0xff]  ;;  %v4489_v31 = vand.u32 127, %v37_v0  ;;  %v4356_v33 = vmov 1.0  }
   0x8   :  { %44 = vbcast.lane.b32.xlu0 %v42_v14, 256  ;;  %v3939_v21 = vpack.c.bf16 %v68_v20, %v67_v19  ;;  %v69_v22 = vld [vmem:[%s5057_s2 + $0x50] sm:$0xff]  ;;  %v70_v23 = vld [vmem:[%s5057_s2 + $0x58] sm:$0xff]  ;;  %v71_v25 = vld [vmem:[%s5057_s2 + $0x60] sm:$0xff]  ;;  %vm180_vm2 = vcmask 261120   ;;  %vm311_vm3 = vcmask 64512  }
   0x9   :  { %3930 = vmatpush3.bf16.msra.mxu0 %v3927_v7  ;;  %v3943_v24 = vpack.c.bf16 %v70_v23, %v69_v22  ;;  %v72_v26 = vld [vmem:[%s5057_s2 + $0x68] sm:$0xff]  ;;  %v73_v28 = vld [vmem:[%s5057_s2 + $0x70] sm:$0xff]  ;;  %v74_v29 = vld [vmem:[%s5057_s2 + $0x78] sm:$0xff]  ;;  %s4357_s17 = smov 80   ;;  %s4358_s18 = smov 96   ;;  %vm676_vm15 = vcmask 130048  }
   0xa   :  { %3932 = vmatprep.subr.bf16.mxu0 %v3931_v13  ;;  %v3947_v27 = vpack.c.bf16 %v72_v26, %v71_v25  ;;  %v3951_v30 = vpack.c.bf16 %v74_v29, %v73_v28  ;;  %v75_v35 = vld [vmem:[%s5058_s3] sm:$0xff]  ;;  %v76_v37 = vld [vmem:[%s5058_s3 + $0x8] sm:$0xff]  ;;  %v222_v55 = vld [vmem:[%s5059_s4 + $0x10] sm:$0xff]  ;;  %s4359_s19 = smov 88   ;;  %s4360_s20 = smov 120  }
   0xb   :  { %v220_v53 = vld [vmem:[%s5059_s4] sm:$0xff]  ;;  %v221_v54 = vld [vmem:[%s5059_s4 + $0x8] sm:$0xff]  ;;  %v223_v57 = vld [vmem:[%s5059_s4 + $0x18] sm:$0xff]  ;;  %s4361_s21 = smov 72   ;;  %s4362_s22 = smov 112  }
   0xc   :  { %51 = vbcast.lane.b32.xlu0 %v49_v17, 256  ;;  %v3955_v56 = vpack.c.bf16 %v221_v54, %v220_v53  ;;  %v3959_v58 = vpack.c.bf16 %v223_v57, %v222_v55  ;;  %v4526_v1 = vld [vmem:[%s5064_s9] sm:$0xff]  ;;  %s4363_s23 = smov 104   ;;  %vm4553_vm4 = vmpackc.low %vm311_vm3, %vm311_vm3  ;;  %v161_v53 = vand.u32 7, %v4440_v6  ;;  %v4365_v55 = vmov -1e+30  }
   0xd   :  { %3934 = vmatpush3.bf16.msra.mxu0 %v3931_v13  ;;  %v211_v2 = vrot.slane %v4526_v1, %v4452_v11  ;;  %v217_v5 = vrot.slane %v4526_v1, %v4455_v12  ;;  %s4367_s26 = smov 56   ;;  %s4368_s27 = smov 48  }
   0xe   :  { %3936 = vmatprep.subr.bf16.mxu0 %v3935_v18  ;;  %3956 = vmatprep.subr.bf16.mxu1 %v3955_v56  ;;  %s4369_s30 = smov 40  }
   0xf   :  { %3958 = vmatpush3.bf16.msra.mxu1 %v3955_v56 }
  0x10   :  { %3960 = vmatprep.subr.bf16.mxu1 %v3959_v58 }
  0x11   :  { %3938 = vmatpush3.bf16.msra.mxu0 %v3935_v18 }
  0x12   :  { %3940 = vmatprep.subr.bf16.mxu0 %v3939_v21 }
  0x13   :  { %3962 = vmatpush3.bf16.msra.mxu1 %v3959_v58 }
  0x15   :  { %3942 = vmatpush3.bf16.msra.mxu0 %v3939_v21 }
  0x16   :  { %3944 = vmatprep.subr.bf16.mxu0 %v3943_v24 }
  0x19   :  { %3946 = vmatpush3.bf16.msra.mxu0 %v3943_v24 }
  0x1a   :  { %3948 = vmatprep.subr.bf16.mxu0 %v3947_v27 }
  0x1d   :  { %3950 = vmatpush3.bf16.msra.mxu0 %v3947_v27 }
  0x1e   :  { %3952 = vmatprep.subr.bf16.mxu0 %v3951_v30 }
  0x21   :  { %3954 = vmatpush3.bf16.msra.mxu0 %v3951_v30 }
  0x7a   :  { %v45_v32 = vpop.permute.xlu0 %44 }
  0x7b   :  { %vm53_vm0 = vcmp.eq.s32.totalorder %v4489_v31, %v45_v32 }
  0x7c   :  { %3643 = vmatprep.mubr.msk.f32.mxu0 %vm53_vm0, %v4356_v33 }
  0x7e   :  { %v52_v34 = vpop.permute.xlu0 %51 }
  0x7f   :  { %vm54_vm1 = vcmp.eq.s32.totalorder %v4489_v31, %v52_v34 }
  0x80   :  { %3644 = vmatmul.mubr.msk.f32.vlgmr.msra.gmra.mrb[0].mxu0 %vm54_vm1, %v4356_v33 }
 0x153   :  { %v3645_v36 = vpop.f32.mrb[0].mxu0 }
 0x154   :  { %v143_v38 = vpop.f32.mrb[1].mxu0  ;;  %v4501_v40 = vadd.f32 %v3645_v36, %v76_v37 }
 0x155   :  { %v4499_v39 = vadd.f32 %v143_v38, %v75_v35 }
 0x156   :  { %v184_v42 = vsel %vm180_vm2, %v4501_v40, 0.0 }
 0x157   :  { %v181_v41 = vsel %vm180_vm2, %v4499_v39, 0.0 }
 0x158   :  { %182 = vadd.xlane.f32.xlu1 %v181_v41 }
 0x15c   :  { %185 = vadd.xlane.f32.xlu1 %v184_v42 }
 0x1e5   :  { %v183_v43 = vpop.xlane.xlu1 %182 }
 0x1e6   :  { %v188_v44 = vmul.f32 0.03125, %v183_v43 }
 0x1e8   :  { %v190_v45 = vsub.f32 %v4499_v39, %v188_v44  ;;  %v165_v44 = vld [vmem:[%s5056_s1] sm:$0x1]  ;;  %s4366_s1 = smov 64  }
 0x1e9   :  { %v186_v46 = vpop.xlane.xlu1 %185  ;;  %vm166_vm5 = vcmp.gt.f32.partialorder %v165_v44, 0.5 }
 0x1ea   :  { %v189_v47 = vmul.f32 0.03125, %v186_v46  ;;  %v192_v48 = vmul.f32 %v190_v45, %v190_v45  ;;  %v157_v46 = vshra.s32 %v4489_v31, 3 }
 0x1ec   :  { %v191_v49 = vsub.f32 %v4501_v40, %v189_v47  ;;  %v194_v50 = vsel %vm180_vm2, %v192_v48, 0.0  ;;  %v160_v48 = vand.u32 7, %v4489_v31 }
 0x1ed   :  { %195 = vadd.xlane.f32.xlu0 %v194_v50  ;;  %v4364_v50 = vmov 0  }
 0x1ee   :  { %v193_v51 = vmul.f32 %v191_v49, %v191_v49  ;;  %vm163_vm9 = vcmp.le.s32.totalorder %v160_v48, %v161_v53 }
 0x1f0   :  { %v197_v52 = vsel %vm180_vm2, %v193_v51, 0.0  ;;  %v169_v51 = vsel %vm166_vm5, 1, %v4364_v50 }
 0x1f1   :  { %198 = vadd.xlane.f32.xlu1 %v197_v52  ;;  %v155_v52 = vshra.s32 %v4440_v6, 3  ;;  %v173_v54 = vrot.slane %v169_v51, %v4452_v11 }
 0x1f3   :  { %vm158_vm8 = vcmp.eq.s32.totalorder %v155_v52, %v157_v46  ;;  %vm174_vm11 = vcmp.eq.s32.totalorder %v173_v54, 1 }
 0x1f4   :  { %vm167_vm12 = vmand %vm158_vm8, %vm163_vm9 }
 0x1f5   :  { %vm175_vm14 = vmand %vm167_vm12, %vm174_vm11 }
 0x1f6   :  { %v4591_v56 = vsel %vm175_vm14, 0.0, %v4365_v55 }
 0x27a   :  { %v196_v59 = vpop.xlane.xlu0 %195 }
 0x27b   :  { %v200_v60 = vmul.f32 0.03125, %v196_v59 }
 0x27d   :  { %v202_v61 = vadd.f32 1e-05, %v200_v60 }
 0x27e   :  { %v199_v62 = vpop.xlane.xlu1 %198 }
 0x27f   :  { %4248 = vrsqrt.f32 %v202_v61  ;;  %v201_v63 = vmul.f32 0.03125, %v199_v62 }
 0x281   :  { %v203_v0 = vadd.f32 1e-05, %v201_v63 }
 0x283   :  { %4250 = vrsqrt.f32 %v203_v0 }
 0x289   :  { %v4249_v3 = vpop.eup %4248 }
 0x28a   :  { %v206_v4 = vmul.f32 %v4249_v3, %v190_v45  ;;  %v154_v45 = vadd.s32 8, %v4440_v6 }
 0x28c   :  { %v212_v7 = vmul.f32 %v211_v2, %v206_v4  ;;  %v156_v47 = vshra.s32 %v154_v45, 3 }
 0x28d   :  { %v4251_v8 = vpop.eup %4250 }
 0x28e   :  { %v207_v9 = vmul.f32 %v4251_v8, %v191_v49  ;;  %v218_v10 = vadd.f32 %v217_v5, %v212_v7  ;;  %v162_v49 = vand.u32 7, %v154_v45  ;;  %vm159_vm6 = vcmp.eq.s32.totalorder %v156_v47, %v157_v46 }
 0x290   :  { %v213_v13 = vmul.f32 %v211_v2, %v207_v9  ;;  %3654 = vmatprep.mubr.msk.f32.mxu1 %vm180_vm2, %v218_v10  ;;  %vm164_vm7 = vcmp.le.s32.totalorder %v160_v48, %v162_v49 }
 0x291   :  { %vm168_vm10 = vmand %vm159_vm6, %vm164_vm7 }
 0x292   :  { %v219_v14 = vadd.f32 %v217_v5, %v213_v13  ;;  %vm176_vm13 = vmand %vm168_vm10, %vm174_vm11 }
 0x293   :  { %v4589_v31 = vsel %vm176_vm13, 0.0, %v4365_v55 }
 0x294   :  { %3655 = vmatmul.mubr.msk.f32.vlgmr.msra.gmra.mrb[0].mxu1 %vm180_vm2, %v219_v14 }
 0x367   :  { %v3656_v15 = vpop.f32.mrb[0].mxu1 }
 0x368   :  { %v296_v16 = vpop.f32.mrb[1].mxu1 }
 0x369   :  { %3661 = vmatprep.mubr.msk.f32.mxu1 %vm311_vm3, %v296_v16  ;;  %v4535_v17 = vpack.i.bf16 %v3656_v15, %v296_v16 }
 0x36b   :  { %4179 = vrot.lane.b32.xlu0 %v4535_v17, %s4357_s17  ;;  %4169 = vrot.lane.b32.xlu1 %v4535_v17, %s4358_s18 }
 0x36f   :  { %4174 = vrot.lane.b32.xlu1 %v4535_v17, %s4359_s19 }
 0x373   :  { %395 = vrot.lane.b32.xlu1 %v296_v16, %s4360_s20 }
 0x377   :  { %397 = vrot.lane.b32.xlu1 %v3656_v15, %s4360_s20 }
 0x37b   :  { %4184 = vrot.lane.b32.xlu1 %v4535_v17, %s4361_s21 }
 0x37f   :  { %486 = vrot.lane.b32.xlu1 %v296_v16, %s4362_s22 }
 0x383   :  { %488 = vrot.lane.b32.xlu1 %v3656_v15, %s4362_s22 }
 0x387   :  { %577 = vrot.lane.b32.xlu1 %v296_v16, %s4363_s23 }
 0x38b   :  { %579 = vrot.lane.b32.xlu1 %v3656_v15, %s4363_s23 }
 0x3dd   :  { %v4170_v18 = vpop.permute.xlu1 %4169  ;;  %v4180_v26 = vpop.permute.xlu0 %4179 }
 0x3de   :  { %v4172_v19 = vunpack.i.h.bf16 %v4170_v18  ;;  %v4171_v20 = vunpack.i.l.bf16 %v4170_v18  ;;  %v4182_v29 = vunpack.i.h.bf16 %v4180_v26  ;;  %v4181_v30 = vunpack.i.l.bf16 %v4180_v26 }
 0x3e0   :  { %v3963_v22 = vpack.c.bf16 %v4172_v19, %v4171_v20  ;;  %v3975_v33 = vpack.c.bf16 %v4182_v29, %v4181_v30 }
 0x3e1   :  { %v4175_v23 = vpop.permute.xlu1 %4174 }
 0x3e2   :  { %v4177_v24 = vunpack.i.h.bf16 %v4175_v23  ;;  %v4176_v25 = vunpack.i.l.bf16 %v4175_v23  ;;  %3965 = vmatprep.subr.msk.bf16.mxu1 %vm4553_vm4, %v3963_v22 }
 0x3e3   :  { %3968 = vmatpush3.bf16.xpose.msk.msra.mxu1 %vm4553_vm4, %v3963_v22 }
 0x3e4   :  { %v3969_v27 = vpack.c.bf16 %v4177_v24, %v4176_v25 }
 0x3e5   :  { %v396_v28 = vpop.permute.xlu1 %395 }
 0x3e6   :  { %3971 = vmatprep.subr.msk.bf16.mxu1 %vm4553_vm4, %v3969_v27 }
 0x3e9   :  { %v398_v32 = vpop.permute.xlu1 %397 }
 0x3ea   :  { %3662 = vmatmul.mubr.msk.f32.vlgmr.msra.gmra.mrb[2].mxu1 %vm311_vm3, %v3656_v15 }
 0x3eb   :  { %3974 = vmatpush3.bf16.xpose.msk.msra.mxu1 %vm4553_vm4, %v3969_v27  ;;  %3668 = vmatprep.mubr.msk.f32.mxu1 %vm311_vm3, %v396_v28 }
 0x3ec   :  { %3977 = vmatprep.subr.msk.bf16.mxu1 %vm4553_vm4, %v3975_v33 }
 0x3ed   :  { %v4185_v34 = vpop.permute.xlu1 %4184 }
 0x3ee   :  { %v4187_v35 = vunpack.i.h.bf16 %v4185_v34  ;;  %v4186_v36 = vunpack.i.l.bf16 %v4185_v34 }
 0x3f0   :  { %v3981_v38 = vpack.c.bf16 %v4187_v35, %v4186_v36 }
 0x3f1   :  { %v487_v37 = vpop.permute.xlu1 %486 }
 0x3f2   :  { %3669 = vmatmul.mubr.msk.f32.vlgmr.msra.gmra.mrb[4].mxu1 %vm311_vm3, %v398_v32 }
 0x3f3   :  { %3980 = vmatpush3.bf16.xpose.msk.msra.mxu1 %vm4553_vm4, %v3975_v33  ;;  %3675 = vmatprep.mubr.msk.f32.mxu1 %vm311_vm3, %v487_v37 }
 0x3f4   :  { %3983 = vmatprep.subr.msk.bf16.mxu1 %vm4553_vm4, %v3981_v38 }
 0x3f5   :  { %v489_v41 = vpop.permute.xlu1 %488 }
 0x3f9   :  { %v578_v42 = vpop.permute.xlu1 %577 }
 0x3fa   :  { %3676 = vmatmul.mubr.msk.f32.vlgmr.msra.gmra.mrb[6].mxu1 %vm311_vm3, %v489_v41 }
 0x3fb   :  { %3986 = vmatpush3.bf16.xpose.msk.msra.mxu1 %vm4553_vm4, %v3981_v38  ;;  %3682 = vmatprep.mubr.msk.f32.mxu1 %vm311_vm3, %v578_v42 }
 0x3fd   :  { %v580_v43 = vpop.permute.xlu1 %579 }
 0x402   :  { %3683 = vmatmul.mubr.msk.f32.vlgmr.msra.gmra.mrb[8].mxu1 %vm311_vm3, %v580_v43 }
 0x4bd   :  { %v3663_v57 = vpop.f32.mrb[2].mxu1 }
 0x4be   :  { %v669_v58 = vadd.f32 %v3663_v57, %v4589_v31  ;;  %v386_v59 = vpop.f32.mrb[3].mxu1 }
 0x4bf   :  { %v668_v60 = vadd.f32 %v386_v59, %v4591_v56 }
 0x4c0   :  { %v680_v61 = vsel %vm676_vm15, %v669_v58, -inf }
 0x4c1   :  { %681 = vmax.xlane.f32.xlu1 %v680_v61  ;;  %v677_v62 = vsel %vm676_vm15, %v668_v60, -inf }
 0x4c2   :  { %678 = vmax.xlane.f32.xlu0 %v677_v62 }
 0x4c5   :  { %v3670_v63 = vpop.f32.mrb[4].mxu1 }
 0x4c6   :  { %v477_v0 = vpop.f32.mrb[5].mxu1  ;;  %v671_v3 = vadd.f32 %v3670_v63, %v4589_v31 }
 0x4c7   :  { %v670_v2 = vadd.f32 %v477_v0, %v4591_v56 }
 0x4c8   :  { %v686_v7 = vsel %vm676_vm15, %v671_v3, -inf }
 0x4c9   :  { %v683_v4 = vsel %vm676_vm15, %v670_v2, -inf }
 0x4ca   :  { %684 = vmax.xlane.f32.xlu0 %v683_v4 }
 0x4cd   :  { %v3677_v5 = vpop.f32.mrb[6].mxu1 }
 0x4ce   :  { %687 = vmax.xlane.f32.xlu0 %v686_v7  ;;  %v568_v8 = vpop.f32.mrb[7].mxu1  ;;  %v673_v37 = vadd.f32 %v3677_v5, %v4589_v31 }
 0x4cf   :  { %v672_v36 = vadd.f32 %v568_v8, %v4591_v56 }
 0x4d0   :  { %v692_v43 = vsel %vm676_vm15, %v673_v37, -inf }
 0x4d1   :  { %v689_v41 = vsel %vm676_vm15, %v672_v36, -inf }
 0x4d5   :  { %v3684_v9 = vpop.f32.mrb[8].mxu1 }
 0x4d6   :  { %v659_v10 = vpop.f32.mrb[9].mxu1  ;;  %v675_v42 = vadd.f32 %v3684_v9, %v4589_v31 }
 0x4d7   :  { %v674_v38 = vadd.f32 %v659_v10, %v4591_v56 }
 0x4d8   :  { %v698_v45 = vsel %vm676_vm15, %v675_v42, -inf }
 0x4d9   :  { %v695_v44 = vsel %vm676_vm15, %v674_v38, -inf }
 0x54e   :  { %v682_v13 = vpop.xlane.xlu1 %681 }
 0x54f   :  { %v702_v14 = vsub.f32 %v669_v58, %v682_v13  ;;  %v679_v15 = vpop.xlane.xlu0 %678 }
 0x550   :  { %v701_v16 = vsub.f32 %v668_v60, %v679_v15 }
 0x551   :  { %v711_v18 = vmul.f32 1.442695, %v702_v14 }
 0x552   :  { %v709_v19 = vmul.f32 1.442695, %v701_v16 }
 0x553   :  { %4252 = vpow2.f32 %v711_v18 }
 0x554   :  { %4254 = vpow2.f32 %v709_v19 }
 0x557   :  { %v685_v20 = vpop.xlane.xlu0 %684 }
 0x558   :  { %v703_v22 = vsub.f32 %v670_v2, %v685_v20 }
 0x55a   :  { %v713_v23 = vmul.f32 1.442695, %v703_v22 }
 0x55b   :  { %v688_v24 = vpop.xlane.xlu0 %687 }
 0x55c   :  { %4256 = vpow2.f32 %v713_v23  ;;  %v704_v25 = vsub.f32 %v671_v3, %v688_v24 }
 0x55d   :  { %v4253_v26 = vpop.eup %4252 }
 0x55e   :  { %v4255_v27 = vpop.eup %4254  ;;  %v715_v28 = vmul.f32 1.442695, %v704_v25  ;;  %v728_v29 = vsel %vm676_vm15, %v4253_v26, 0.0 }
 0x55f   :  { %729 = vadd.xlane.f32.xlu0 %v728_v29  ;;  %v725_v30 = vsel %vm676_vm15, %v4255_v27, 0.0  ;;  %v766_v29 = vld [vmem:[%s5060_s5 + $0x8] sm:$0xff] }
 0x560   :  { %4258 = vpow2.f32 %v715_v28  ;;  %726 = vadd.xlane.f32.xlu1 %v725_v30  ;;  %v765_v30 = vld [vmem:[%s5060_s5] sm:$0xff] }
 0x561   :  { %3704 = vmatprep.subr.mxu0 %v765_v30 }
 0x562   :  { %3705 = vmatpush3.msra.mxu0 %v765_v30 }
 0x566   :  { %v4257_v32 = vpop.eup %4256 }
 0x567   :  { %v731_v33 = vsel %vm676_vm15, %v4257_v32, 0.0 }
 0x568   :  { %732 = vadd.xlane.f32.xlu1 %v731_v33 }
 0x56a   :  { %v4259_v34 = vpop.eup %4258 }
 0x56b   :  { %v734_v35 = vsel %vm676_vm15, %v4259_v34, 0.0 }
 0x56c   :  { %735 = vadd.xlane.f32.xlu0 %v734_v35 }
 0x579   :  { %4189 = vrot.lane.b32.xlu1 %v4535_v17, %s4366_s1 }
 0x582   :  { %4194 = vrot.lane.b32.xlu0 %v4535_v17, %s4367_s26 }
 0x59d   :  { %690 = vmax.xlane.f32.xlu1 %v689_v41 }
 0x5a1   :  { %693 = vmax.xlane.f32.xlu0 %v692_v43  ;;  %696 = vmax.xlane.f32.xlu1 %v695_v44 }
 0x5a5   :  { %699 = vmax.xlane.f32.xlu0 %v698_v45 }
 0x5ec   :  { %v730_v47 = vpop.xlane.xlu0 %729 }
 0x5ed   :  { %v727_v46 = vpop.xlane.xlu1 %726 }
 0x5ee   :  { %4260 = vrcp.f32 %v727_v46 }
 0x5ef   :  { %4262 = vrcp.f32 %v730_v47 }
 0x5f5   :  { %v733_v48 = vpop.xlane.xlu1 %732 }
 0x5f6   :  { %4264 = vrcp.f32 %v733_v48 }
 0x5f8   :  { %v4261_v49 = vpop.eup %4260 }
 0x5f9   :  { %v4190_v50 = vpop.permute.xlu1 %4189  ;;  %v736_v51 = vpop.xlane.xlu0 %735  ;;  %v750_v52 = vmul.f32 %v4261_v49, %v4255_v27 }
 0x5fa   :  { %v4192_v53 = vunpack.i.h.bf16 %v4190_v50  ;;  %v4191_v54 = vunpack.i.l.bf16 %v4190_v50  ;;  %4266 = vrcp.f32 %v736_v51  ;;  %v4263_v57 = vpop.eup %4262 }
 0x5fb   :  { %3689 = vmatprep.mubr.msk.f32.mxu1 %vm676_vm15, %v750_v52  ;;  %v752_v62 = vmul.f32 %v4263_v57, %v4253_v26 }
 0x5fc   :  { %v3987_v55 = vpack.c.bf16 %v4192_v53, %v4191_v54 }
 0x5fd   :  { %v4195_v58 = vpop.permute.xlu0 %4194 }
 0x5fe   :  { %v4197_v59 = vunpack.i.h.bf16 %v4195_v58  ;;  %v4196_v60 = vunpack.i.l.bf16 %v4195_v58  ;;  %3988 = vmatprep.subr.bf16.mxu1 %v3987_v55 }
 0x5ff   :  { %3990 = vmatpush3.bf16.msra.mxu1 %v3987_v55 }
 0x600   :  { %v4265_v61 = vpop.eup %4264  ;;  %v3991_v63 = vpack.c.bf16 %v4197_v59, %v4196_v60  ;;  %v768_v59 = vld [vmem:[%s5060_s5 + $0x18] sm:$0xff] }
 0x601   :  { %v754_v0 = vmul.f32 %v4265_v61, %v4257_v32  ;;  %v767_v32 = vld [vmem:[%s5060_s5 + $0x10] sm:$0xff] }
 0x602   :  { %3690 = vmatmul.mubr.msk.f32.vlgmr.msra.gmra.mrb[10].mxu1 %vm676_vm15, %v752_v62  ;;  %3992 = vmatprep.subr.bf16.mxu1 %v3991_v63 }
 0x603   :  { %3994 = vmatpush3.bf16.msra.mxu1 %v3991_v63  ;;  %3696 = vmatprep.mubr.msk.f32.mxu1 %vm676_vm15, %v754_v0 }
 0x604   :  { %v4267_v2 = vpop.eup %4266  ;;  %3699 = vmatprep.subr.mxu1 %v766_v29  ;;  %3716 = vmatprep.subr.mxu0 %v767_v32 }
 0x605   :  { %v756_v3 = vmul.f32 %v4267_v2, %v4259_v34 }
 0x607   :  { %3697 = vmatmul.mubr.msk.f32.vlgmr.msra.gmra.mrb[12].mxu1 %vm676_vm15, %v756_v3  ;;  %v1449_v3 = vsub.s32 4, %v4440_v6 }
 0x608   :  { %3700 = vmatpush3.msra.mxu1 %v766_v29  ;;  %v1492_v29 = vld [vmem:[%s5061_s6 + $0x8] sm:$0xff] }
 0x62a   :  { %v691_v4 = vpop.xlane.xlu1 %690 }
 0x62b   :  { %v705_v5 = vsub.f32 %v672_v36, %v691_v4 }
 0x62d   :  { %v717_v7 = vmul.f32 1.442695, %v705_v5 }
 0x62e   :  { %v694_v8 = vpop.xlane.xlu0 %693  ;;  %v697_v9 = vpop.xlane.xlu1 %696 }
 0x62f   :  { %4268 = vpow2.f32 %v717_v7  ;;  %v706_v10 = vsub.f32 %v673_v37, %v694_v8  ;;  %v707_v13 = vsub.f32 %v674_v38, %v697_v9  ;;  %v1450_v7 = vrot.slane %v4526_v1, %v1449_v3 }
 0x631   :  { %v719_v14 = vmul.f32 1.442695, %v706_v10  ;;  %v721_v15 = vmul.f32 1.442695, %v707_v13 }
 0x632   :  { %v700_v16 = vpop.xlane.xlu0 %699 }
 0x633   :  { %4270 = vpow2.f32 %v719_v14  ;;  %v708_v18 = vsub.f32 %v675_v42, %v700_v16 }
 0x634   :  { %4272 = vpow2.f32 %v721_v15 }
 0x635   :  { %v723_v19 = vmul.f32 1.442695, %v708_v18 }
 0x637   :  { %4274 = vpow2.f32 %v723_v19 }
 0x639   :  { %v4269_v20 = vpop.eup %4268 }
 0x63a   :  { %v737_v22 = vsel %vm676_vm15, %v4269_v20, 0.0 }
 0x63b   :  { %738 = vadd.xlane.f32.xlu1 %v737_v22 }
 0x63d   :  { %v4271_v23 = vpop.eup %4270 }
 0x63e   :  { %v4273_v24 = vpop.eup %4272  ;;  %v740_v25 = vsel %vm676_vm15, %v4271_v23, 0.0 }
 0x63f   :  { %741 = vadd.xlane.f32.xlu0 %v740_v25  ;;  %v743_v26 = vsel %vm676_vm15, %v4273_v24, 0.0 }
 0x640   :  { %744 = vadd.xlane.f32.xlu1 %v743_v26 }
 0x641   :  { %v4275_v27 = vpop.eup %4274 }
 0x642   :  { %v746_v28 = vsel %vm676_vm15, %v4275_v27, 0.0 }
 0x643   :  { %747 = vadd.xlane.f32.xlu0 %v746_v28  ;;  %v1491_v28 = vld [vmem:[%s5061_s6] sm:$0xff] }
 0x644   :  { %v4003_v30 = vpack.c.bf16 %v1492_v29, %v1491_v28 }
 0x651   :  { %4199 = vrot.lane.b32.xlu1 %v4535_v17, %s4368_s27 }
 0x659   :  { %4204 = vrot.lane.b32.xlu0 %v4535_v17, %s4369_s30 }
 0x6c8   :  { %v739_v33 = vpop.xlane.xlu1 %738 }
 0x6c9   :  { %4276 = vrcp.f32 %v739_v33  ;;  %v1494_v33 = vld [vmem:[%s5061_s6 + $0x18] sm:$0xff] }
 0x6cc   :  { %v742_v34 = vpop.xlane.xlu0 %741 }
 0x6cd   :  { %v745_v35 = vpop.xlane.xlu1 %744  ;;  %4278 = vrcp.f32 %v742_v34 }
 0x6ce   :  { %4280 = vrcp.f32 %v745_v35  ;;  %v1582_v35 = vld [vmem:[%s5062_s7] sm:$0xff] }
 0x6d0   :  { %v748_v36 = vpop.xlane.xlu0 %747 }
 0x6d1   :  { %v4200_v37 = vpop.permute.xlu1 %4199  ;;  %4282 = vrcp.f32 %v748_v36  ;;  %v1583_v36 = vld [vmem:[%s5062_s7 + $0x8] sm:$0xff] }
 0x6d2   :  { %v4202_v38 = vunpack.i.h.bf16 %v4200_v37  ;;  %v4201_v41 = vunpack.i.l.bf16 %v4200_v37  ;;  %v1584_v37 = vld [vmem:[%s5062_s7 + $0x10] sm:$0xff] }
 0x6d3   :  { %v4277_v45 = vpop.eup %4276 }
 0x6d4   :  { %v3995_v42 = vpack.c.bf16 %v4202_v38, %v4201_v41  ;;  %v4205_v44 = vpop.permute.xlu0 %4204  ;;  %v758_v51 = vmul.f32 %v4277_v45, %v4269_v20  ;;  %v4011_v38 = vpack.c.bf16 %v1583_v36, %v1582_v35  ;;  %v1585_v41 = vld [vmem:[%s5062_s7 + $0x18] sm:$0xff]  ;;  %v1588_v45 = vld [vmem:[%s5062_s7 + $0x30] sm:$0xff] }
 0x6d5   :  { %v3691_v43 = vpop.f32.mrb[10].mxu1  ;;  %v4207_v46 = vunpack.i.h.bf16 %v4205_v44  ;;  %v4206_v47 = vunpack.i.l.bf16 %v4205_v44  ;;  %v1587_v44 = vld [vmem:[%s5062_s7 + $0x28] sm:$0xff] }
 0x6d6   :  { %3996 = vmatprep.subr.bf16.mxu1 %v3995_v42  ;;  %v847_v17 = vpop.f32.mrb[11].mxu1 }
 0x6d7   :  { %3706 = vmatprep.mubr.msk.f32.mxu0 %vm311_vm3, %v847_v17  ;;  %v4279_v50 = vpop.eup %4278  ;;  %v3999_v53 = vpack.c.bf16 %v4207_v46, %v4206_v47  ;;  %v1589_v46 = vld [vmem:[%s5062_s7 + $0x38] sm:$0xff] }
 0x6d8   :  { %3707 = vmatmul.mubr.msk.f32.vlgmr.msra.gmra.mrb[2].mxu0 %vm311_vm3, %v3691_v43  ;;  %v4281_v52 = vpop.eup %4280  ;;  %v760_v54 = vmul.f32 %v4279_v50, %v4271_v23  ;;  %v1586_v43 = vld [vmem:[%s5062_s7 + $0x20] sm:$0xff]  ;;  %v4023_v47 = vpack.c.bf16 %v1589_v46, %v1588_v45 }
 0x6d9   :  { %3717 = vmatpush3.msra.mxu0 %v767_v32  ;;  %v762_v57 = vmul.f32 %v4281_v52, %v4273_v24  ;;  %v1493_v32 = vld [vmem:[%s5061_s6 + $0x10] sm:$0xff]  ;;  %v4019_v17 = vpack.c.bf16 %v1587_v44, %v1586_v43  ;;  %v1593_v52 = vld [vmem:[%s5062_s7 + $0x58] sm:$0xff] }
 0x6da   :  { %v3698_v48 = vpop.f32.mrb[12].mxu1  ;;  %3728 = vmatprep.subr.mxu0 %v768_v59  ;;  %v4007_v34 = vpack.c.bf16 %v1494_v33, %v1493_v32 }
 0x6db   :  { %v934_v49 = vpop.f32.mrb[13].mxu1  ;;  %v4283_v55 = vpop.eup %4282 }
 0x6dc   :  { %3701 = vmatprep.mubr.msk.f32.mxu1 %vm311_vm3, %v934_v49  ;;  %v764_v58 = vmul.f32 %v4283_v55, %v4275_v27  ;;  %v1591_v49 = vld [vmem:[%s5062_s7 + $0x48] sm:$0xff] }
 0x6dd   :  { %3702 = vmatmul.mubr.msk.f32.vlgmr.msra.gmra.mrb[14].mxu1 %vm311_vm3, %v3698_v48  ;;  %v1590_v48 = vld [vmem:[%s5062_s7 + $0x40] sm:$0xff]  ;;  %v1595_v55 = vld [vmem:[%s5062_s7 + $0x68] sm:$0xff] }
 0x6de   :  { %3998 = vmatpush3.bf16.msra.mxu1 %v3995_v42  ;;  %3713 = vmatprep.mubr.msk.f32.mxu1 %vm676_vm15, %v758_v51  ;;  %v4015_v42 = vpack.c.bf16 %v1585_v41, %v1584_v37  ;;  %v4027_v50 = vpack.c.bf16 %v1591_v49, %v1590_v48  ;;  %v1592_v51 = vld [vmem:[%s5062_s7 + $0x50] sm:$0xff]  ;;  %v3372_v49 = vld [vmem:[%s5059_s4 + $0x20] sm:$0xff] }
 0x6df   :  { %4000 = vmatprep.subr.bf16.mxu1 %v3999_v53 }
 0x6e1   :  { %3714 = vmatmul.mubr.msk.f32.vlgmr.msra.gmra.mrb[16].mxu1 %vm676_vm15, %v760_v54  ;;  %v1594_v54 = vld [vmem:[%s5062_s7 + $0x60] sm:$0xff] }
 0x6e2   :  { %4002 = vmatpush3.bf16.msra.mxu1 %v3999_v53  ;;  %3725 = vmatprep.mubr.msk.f32.mxu1 %vm676_vm15, %v762_v57  ;;  %v4031_v53 = vpack.c.bf16 %v1593_v52, %v1592_v51  ;;  %v4035_v57 = vpack.c.bf16 %v1595_v55, %v1594_v54  ;;  %v3374_v52 = vld [vmem:[%s5059_s4 + $0x30] sm:$0xff] }
 0x6e3   :  { %4004 = vmatprep.subr.bf16.mxu1 %v4003_v30 }
 0x6e5   :  { %3726 = vmatmul.mubr.msk.f32.vlgmr.msra.gmra.mrb[18].mxu1 %vm676_vm15, %v764_v58 }
 0x6e6   :  { %4006 = vmatpush3.bf16.msra.mxu1 %v4003_v30  ;;  %v1677_v30 = vsub.s32 5, %v4440_v6 }
 0x6e7   :  { %4008 = vmatprep.subr.bf16.mxu1 %v4007_v34 }
 0x6e8   :  { %v1678_v32 = vrot.slane %v4526_v1, %v1677_v30 }
 0x6ea   :  { %4010 = vmatpush3.bf16.msra.mxu1 %v4007_v34 }
 0x7b0   :  { %v3703_v60 = vpop.f32.mrb[14].mxu1 }
 0x7b1   :  { %v1015_v61 = vpop.f32.mrb[15].mxu1 }
 0x7b4   :  { %v3715_v62 = vpop.f32.mrb[16].mxu1 }
 0x7b5   :  { %v1183_v63 = vpop.f32.mrb[17].mxu1 }
 0x7b6   :  { %3718 = vmatprep.mubr.msk.f32.mxu0 %vm311_vm3, %v1183_v63 }
 0x7b7   :  { %3719 = vmatmul.mubr.msk.f32.vlgmr.msra.gmra.mrb[2].mxu0 %vm311_vm3, %v3715_v62 }
 0x7b8   :  { %3729 = vmatpush3.msra.mxu0 %v768_v59  ;;  %v3727_v0 = vpop.f32.mrb[18].mxu1 }
 0x7b9   :  { %v1353_v2 = vpop.f32.mrb[19].mxu1  ;;  %4012 = vmatprep.subr.bf16.mxu0 %v4011_v38 }
 0x7ba   :  { %3730 = vmatprep.mubr.msk.f32.mxu0 %vm311_vm3, %v1353_v2  ;;  %v1487_v2 = vsub.s32 3, %v4440_v6 }
 0x7bf   :  { %3731 = vmatmul.mubr.msk.f32.vlgmr.msra.gmra.mrb[2].mxu0 %vm311_vm3, %v3727_v0  ;;  %v4734_v0 = vsub.s32 2, %v4440_v6 }
 0x7c0   :  { %4014 = vmatpush3.bf16.msra.mxu0 %v4011_v38 }
 0x7c1   :  { %4016 = vmatprep.subr.bf16.mxu0 %v4015_v42 }
 0x7c4   :  { %4018 = vmatpush3.bf16.msra.mxu0 %v4015_v42 }
 0x7c5   :  { %4020 = vmatprep.subr.bf16.mxu0 %v4019_v17 }
 0x7c8   :  { %4022 = vmatpush3.bf16.msra.mxu0 %v4019_v17 }
 0x7c9   :  { %4024 = vmatprep.subr.bf16.mxu0 %v4023_v47 }
 0x7cc   :  { %4026 = vmatpush3.bf16.msra.mxu0 %v4023_v47 }
 0x7cd   :  { %4028 = vmatprep.subr.bf16.mxu0 %v4027_v50 }
 0x7d0   :  { %4030 = vmatpush3.bf16.msra.mxu0 %v4027_v50  ;;  %v3373_v50 = vld [vmem:[%s5059_s4 + $0x28] sm:$0xff] }
 0x7d1   :  { %4032 = vmatprep.subr.bf16.mxu0 %v4031_v53  ;;  %v4043_v51 = vpack.c.bf16 %v3373_v50, %v3372_v49 }
 0x7d3   :  { %4044 = vmatprep.subr.bf16.mxu1 %v4043_v51 }
 0x7d4   :  { %4034 = vmatpush3.bf16.msra.mxu0 %v4031_v53  ;;  %v3375_v53 = vld [vmem:[%s5059_s4 + $0x38] sm:$0xff] }
 0x7d5   :  { %4036 = vmatprep.subr.bf16.mxu0 %v4035_v57  ;;  %v4047_v54 = vpack.c.bf16 %v3375_v53, %v3374_v52 }
 0x7d8   :  { %4038 = vmatpush3.bf16.msra.mxu0 %v4035_v57 }
 0x892   :  { %v3732_v4 = vpop.f32.mrb[2].mxu0 }
 0x893   :  { %v4139_v5 = vadd.f32 %v3732_v4, %v3703_v60  ;;  %v1434_v8 = vpop.f32.mrb[3].mxu0  ;;  %v1482_v4 = vrot.slane %v4526_v1, %v4734_v0 }
 0x894   :  { %v4140_v9 = vadd.f32 %v1434_v8, %v1015_v61 }
 0x895   :  { %v1446_v10 = vadd.f32 %v4139_v5, %v4501_v40 }
 0x896   :  { %v1445_v13 = vadd.f32 %v4140_v9, %v4499_v39 }
 0x897   :  { %v4659_v14 = vadd.f32 %v1450_v7, %v1446_v10  ;;  %v1488_v10 = vrot.slane %v4526_v1, %v1487_v2 }
 0x898   :  { %v4661_v15 = vadd.f32 %v1450_v7, %v1445_v13 }
 0x899   :  { %v1456_v16 = vsel %vm180_vm2, %v4659_v14, 0.0 }
 0x89a   :  { %1457 = vadd.xlane.f32.xlu0 %v1456_v16  ;;  %v1453_v18 = vsel %vm180_vm2, %v4661_v15, 0.0 }
 0x89b   :  { %1454 = vadd.xlane.f32.xlu1 %v1453_v18 }
 0x927   :  { %v1458_v19 = vpop.xlane.xlu0 %1457 }
 0x928   :  { %v1460_v20 = vmul.f32 0.03125, %v1458_v19  ;;  %v1455_v22 = vpop.xlane.xlu1 %1454 }
 0x929   :  { %v1459_v23 = vmul.f32 0.03125, %v1455_v22  ;;  %v1597_v22 = vld [vmem:[%s5062_s7 + $0x78] sm:$0xff] }
 0x92a   :  { %v4668_v40 = vsub.f32 %v4659_v14, %v1460_v20  ;;  %v1596_v20 = vld [vmem:[%s5062_s7 + $0x70] sm:$0xff] }
 0x92b   :  { %v4671_v39 = vsub.f32 %v4661_v15, %v1459_v23  ;;  %v4039_v23 = vpack.c.bf16 %v1597_v22, %v1596_v20 }
 0x92c   :  { %v1464_v24 = vmul.f32 %v4668_v40, %v4668_v40 }
 0x92d   :  { %v1463_v25 = vmul.f32 %v4671_v39, %v4671_v39  ;;  %4040 = vmatprep.subr.bf16.mxu0 %v4039_v23 }
 0x92e   :  { %v1468_v26 = vsel %vm180_vm2, %v1464_v24, 0.0  ;;  %4042 = vmatpush3.bf16.msra.mxu0 %v4039_v23 }
 0x92f   :  { %1469 = vadd.xlane.f32.xlu0 %v1468_v26  ;;  %v1465_v27 = vsel %vm180_vm2, %v1463_v25, 0.0 }
 0x930   :  { %1466 = vadd.xlane.f32.xlu1 %v1465_v27 }
 0x9bc   :  { %v1470_v58 = vpop.xlane.xlu0 %1469 }
 0x9bd   :  { %v1472_v59 = vmul.f32 0.03125, %v1470_v58  ;;  %v1467_v60 = vpop.xlane.xlu1 %1466 }
 0x9be   :  { %v1471_v61 = vmul.f32 0.03125, %v1467_v60 }
 0x9bf   :  { %v1474_v62 = vadd.f32 1e-05, %v1472_v59 }
 0x9c0   :  { %v1473_v63 = vadd.f32 1e-05, %v1471_v61 }
 0x9c1   :  { %4284 = vrsqrt.f32 %v1474_v62  ;;  %v4789_v62 = vld [vmem:[%s5064_s9 + $0x8] sm:$0xff] }
 0x9c2   :  { %4286 = vrsqrt.f32 %v1473_v63  ;;  %v1712_v63 = vrot.slane %v4789_v62, %v4452_v11 }
 0x9cb   :  { %v4285_v5 = vpop.eup %4284 }
 0x9cc   :  { %v4287_v7 = vpop.eup %4286  ;;  %v1478_v8 = vmul.f32 %v4285_v5, %v4668_v40  ;;  %v1497_v40 = vsub.s32 6, %v4440_v6 }
 0x9cd   :  { %v1477_v9 = vmul.f32 %v4287_v7, %v4671_v39 }
 0x9ce   :  { %v1484_v13 = vmul.f32 %v1482_v4, %v1478_v8  ;;  %v1498_v39 = vrot.slane %v4526_v1, %v1497_v40 }
 0x9cf   :  { %v1483_v16 = vmul.f32 %v1482_v4, %v1477_v9  ;;  %v1718_v9 = vrot.slane %v4789_v62, %v4455_v12 }
 0x9d0   :  { %v1490_v19 = vadd.f32 %v1488_v10, %v1484_v13 }
 0x9d1   :  { %v1489_v18 = vadd.f32 %v1488_v10, %v1483_v16 }
 0x9d3   :  { %3741 = vmatprep.mubr.msk.f32.mxu1 %vm180_vm2, %v1489_v18 }
 0x9d4   :  { %3742 = vmatmul.mubr.msk.f32.vlgmr.msra.gmra.mrb[20].mxu1 %vm180_vm2, %v1490_v19 }
 0x9d5   :  { %4046 = vmatpush3.bf16.msra.mxu1 %v4043_v51 }
 0x9d6   :  { %4048 = vmatprep.subr.bf16.mxu1 %v4047_v54 }
 0x9d9   :  { %4050 = vmatpush3.bf16.msra.mxu1 %v4047_v54 }
 0xaa7   :  { %v3743_v24 = vpop.f32.mrb[20].mxu1 }
 0xaa8   :  { %v1577_v25 = vadd.f32 %v3743_v24, %v1498_v39  ;;  %v1571_v26 = vpop.f32.mrb[21].mxu1 }
 0xaa9   :  { %v1572_v27 = vadd.f32 %v1571_v26, %v1498_v39 }
 0xaaa   :  { %v1581_v29 = vmax.f32 %v1577_v25, 0.0 }
 0xaab   :  { %v1580_v28 = vmax.f32 %v1572_v27, 0.0 }
 0xaad   :  { %3776 = vmatprep.mubr.f32.mxu0 %v1580_v28 }
 0xaae   :  { %3777 = vmatmul.mubr.f32.vlgmr.msra.gmra.mrb[4].mxu0 %v1581_v29 }
 0xb81   :  { %v3778_v33 = vpop.f32.mrb[4].mxu0 }
 0xb82   :  { %v1674_v34 = vadd.f32 %v3778_v33, %v4659_v14  ;;  %v1664_v35 = vpop.f32.mrb[5].mxu0 }
 0xb83   :  { %v1673_v36 = vadd.f32 %v1664_v35, %v4661_v15 }
 0xb84   :  { %v4762_v37 = vadd.f32 %v1678_v32, %v1674_v34 }
 0xb85   :  { %v4764_v38 = vadd.f32 %v1678_v32, %v1673_v36 }
 0xb86   :  { %v1686_v41 = vsel %vm180_vm2, %v4762_v37, 0.0 }
 0xb87   :  { %1687 = vadd.xlane.f32.xlu0 %v1686_v41  ;;  %v1683_v42 = vsel %vm180_vm2, %v4764_v38, 0.0 }
 0xb88   :  { %1684 = vadd.xlane.f32.xlu1 %v1683_v42 }
 0xc14   :  { %v1688_v43 = vpop.xlane.xlu0 %1687 }
 0xc15   :  { %v1690_v1 = vmul.f32 0.03125, %v1688_v43  ;;  %v1685_v44 = vpop.xlane.xlu1 %1684 }
 0xc16   :  { %v1689_v17 = vmul.f32 0.03125, %v1685_v44 }
 0xc17   :  { %v1692_v14 = vsub.f32 %v4762_v37, %v1690_v1 }
 0xc18   :  { %v1691_v15 = vsub.f32 %v4764_v38, %v1689_v17 }
 0xc19   :  { %v1694_v45 = vmul.f32 %v1692_v14, %v1692_v14 }
 0xc1a   :  { %v1693_v46 = vmul.f32 %v1691_v15, %v1691_v15 }
 0xc1b   :  { %v1698_v47 = vsel %vm180_vm2, %v1694_v45, 0.0 }
 0xc1c   :  { %1699 = vadd.xlane.f32.xlu0 %v1698_v47  ;;  %v1695_v48 = vsel %vm180_vm2, %v1693_v46, 0.0 }
 0xc1d   :  { %1696 = vadd.xlane.f32.xlu1 %v1695_v48 }
 0xca9   :  { %v1700_v55 = vpop.xlane.xlu0 %1699 }
 0xcaa   :  { %v1702_v57 = vmul.f32 0.03125, %v1700_v55  ;;  %v1697_v58 = vpop.xlane.xlu1 %1696 }
 0xcab   :  { %v1701_v59 = vmul.f32 0.03125, %v1697_v58 }
 0xcac   :  { %v1704_v60 = vadd.f32 1e-05, %v1702_v57 }
 0xcad   :  { %v1703_v61 = vadd.f32 1e-05, %v1701_v59 }
 0xcae   :  { %4288 = vrsqrt.f32 %v1704_v60 }
 0xcaf   :  { %4290 = vrsqrt.f32 %v1703_v61 }
 0xcb8   :  { %v4289_v4 = vpop.eup %4288 }
 0xcb9   :  { %v4291_v5 = vpop.eup %4290  ;;  %v1708_v7 = vmul.f32 %v4289_v4, %v1692_v14 }
 0xcba   :  { %v1707_v8 = vmul.f32 %v4291_v5, %v1691_v15 }
 0xcbb   :  { %v1714_v10 = vmul.f32 %v1712_v63, %v1708_v7 }
 0xcbc   :  { %v1713_v13 = vmul.f32 %v1712_v63, %v1707_v8 }
 0xcbd   :  { %v1720_v18 = vadd.f32 %v1718_v9, %v1714_v10 }
 0xcbe   :  { %v1719_v16 = vadd.f32 %v1718_v9, %v1713_v13 }
 0xcc0   :  { %3787 = vmatprep.mubr.msk.f32.mxu1 %vm180_vm2, %v1719_v16 }
 0xcc1   :  { %3788 = vmatmul.mubr.msk.f32.vlgmr.msra.gmra.mrb[22].mxu1 %vm180_vm2, %v1720_v18 }
 0xd94   :  { %v3789_v19 = vpop.f32.mrb[22].mxu1 }
 0xd95   :  { %v1798_v20 = vpop.f32.mrb[23].mxu1 }
 0xd96   :  { %3794 = vmatprep.mubr.msk.f32.mxu1 %vm311_vm3, %v1798_v20  ;;  %v4798_v22 = vpack.i.bf16 %v3789_v19, %v1798_v20 }
 0xd98   :  { %4214 = vrot.lane.b32.xlu0 %v4798_v22, %s4359_s19  ;;  %4209 = vrot.lane.b32.xlu1 %v4798_v22, %s4358_s18 }
 0xd9c   :  { %4219 = vrot.lane.b32.xlu0 %v4798_v22, %s4357_s17  ;;  %1896 = vrot.lane.b32.xlu1 %v1798_v20, %s4360_s20 }
 0xda0   :  { %1987 = vrot.lane.b32.xlu0 %v1798_v20, %s4362_s22  ;;  %1898 = vrot.lane.b32.xlu1 %v3789_v19, %s4360_s20 }
 0xda4   :  { %2078 = vrot.lane.b32.xlu0 %v1798_v20, %s4363_s23  ;;  %4224 = vrot.lane.b32.xlu1 %v4798_v22, %s4361_s21 }
 0xda8   :  { %1989 = vrot.lane.b32.xlu1 %v3789_v19, %s4362_s22 }
 0xdac   :  { %2080 = vrot.lane.b32.xlu1 %v3789_v19, %s4363_s23 }
 0xe0a   :  { %v4215_v23 = vpop.permute.xlu0 %4214  ;;  %v4210_v39 = vpop.permute.xlu1 %4209 }
 0xe0b   :  { %v4217_v24 = vunpack.i.h.bf16 %v4215_v23  ;;  %v4216_v25 = vunpack.i.l.bf16 %v4215_v23  ;;  %v4212_v26 = vunpack.i.h.bf16 %v4210_v39  ;;  %v4211_v27 = vunpack.i.l.bf16 %v4210_v39 }
 0xe0d   :  { %v4051_v28 = vpack.c.bf16 %v4212_v26, %v4211_v27  ;;  %v4057_v33 = vpack.c.bf16 %v4217_v24, %v4216_v25 }
 0xe0e   :  { %v4220_v29 = vpop.permute.xlu0 %4219  ;;  %v1897_v32 = vpop.permute.xlu1 %1896 }
 0xe0f   :  { %4053 = vmatprep.subr.msk.bf16.mxu1 %vm4553_vm4, %v4051_v28  ;;  %v4222_v36 = vunpack.i.h.bf16 %v4220_v29  ;;  %v4221_v41 = vunpack.i.l.bf16 %v4220_v29 }
 0xe10   :  { %4056 = vmatpush3.bf16.xpose.msk.msra.mxu1 %vm4553_vm4, %v4051_v28 }
 0xe11   :  { %4059 = vmatprep.subr.msk.bf16.mxu1 %vm4553_vm4, %v4057_v33  ;;  %v4063_v1 = vpack.c.bf16 %v4222_v36, %v4221_v41 }
 0xe12   :  { %v1988_v34 = vpop.permute.xlu0 %1987  ;;  %v1899_v35 = vpop.permute.xlu1 %1898 }
 0xe16   :  { %v2079_v42 = vpop.permute.xlu0 %2078  ;;  %v4225_v43 = vpop.permute.xlu1 %4224 }
 0xe17   :  { %v4227_v44 = vunpack.i.h.bf16 %v4225_v43  ;;  %v4226_v17 = vunpack.i.l.bf16 %v4225_v43  ;;  %3795 = vmatmul.mubr.msk.f32.vlgmr.msra.gmra.mrb[24].mxu1 %vm311_vm3, %v3789_v19  ;;  %3815 = vmatprep.mubr.msk.f32.mxu0 %vm311_vm3, %v2079_v42 }
 0xe18   :  { %4062 = vmatpush3.bf16.xpose.msk.msra.mxu1 %vm4553_vm4, %v4057_v33  ;;  %3801 = vmatprep.mubr.msk.f32.mxu1 %vm311_vm3, %v1897_v32 }
 0xe19   :  { %v4069_v14 = vpack.c.bf16 %v4227_v44, %v4226_v17  ;;  %4065 = vmatprep.subr.msk.bf16.mxu1 %vm4553_vm4, %v4063_v1 }
 0xe1a   :  { %v1990_v15 = vpop.permute.xlu1 %1989 }
 0xe1b   :  { %4071 = vmatprep.subr.msk.bf16.mxu0 %vm4553_vm4, %v4069_v14 }
 0xe1c   :  { %4074 = vmatpush3.bf16.xpose.msk.msra.mxu0 %vm4553_vm4, %v4069_v14 }
 0xe1e   :  { %v2081_v45 = vpop.permute.xlu1 %2080 }
 0xe1f   :  { %3802 = vmatmul.mubr.msk.f32.vlgmr.msra.gmra.mrb[26].mxu1 %vm311_vm3, %v1899_v35 }
 0xe20   :  { %4068 = vmatpush3.bf16.xpose.msk.msra.mxu1 %vm4553_vm4, %v4063_v1  ;;  %3808 = vmatprep.mubr.msk.f32.mxu1 %vm311_vm3, %v1988_v34 }
 0xe23   :  { %3816 = vmatmul.mubr.msk.f32.vlgmr.msra.gmra.mrb[6].mxu0 %vm311_vm3, %v2081_v45 }
 0xe27   :  { %3809 = vmatmul.mubr.msk.f32.vlgmr.msra.gmra.mrb[28].mxu1 %vm311_vm3, %v1990_v15 }
 0xeea   :  { %v3796_v46 = vpop.f32.mrb[24].mxu1 }
 0xeeb   :  { %v2170_v47 = vadd.f32 %v3796_v46, %v4589_v31  ;;  %v1887_v48 = vpop.f32.mrb[25].mxu1 }
 0xeec   :  { %v2169_v49 = vadd.f32 %v1887_v48, %v4591_v56 }
 0xeed   :  { %v2180_v50 = vsel %vm676_vm15, %v2170_v47, -inf }
 0xeee   :  { %2181 = vmax.xlane.f32.xlu1 %v2180_v50  ;;  %v2177_v51 = vsel %vm676_vm15, %v2169_v49, -inf }
 0xeef   :  { %2178 = vmax.xlane.f32.xlu0 %v2177_v51 }
 0xef2   :  { %v3803_v21 = vpop.f32.mrb[26].mxu1 }
 0xef3   :  { %v1978_v52 = vpop.f32.mrb[27].mxu1  ;;  %v2172_v54 = vadd.f32 %v3803_v21, %v4589_v31 }
 0xef4   :  { %v2171_v53 = vadd.f32 %v1978_v52, %v4591_v56 }
 0xef5   :  { %v2186_v60 = vsel %vm676_vm15, %v2172_v54, -inf }
 0xef6   :  { %v3817_v55 = vpop.f32.mrb[6].mxu0  ;;  %v2183_v57 = vsel %vm676_vm15, %v2171_v53, -inf }
 0xef7   :  { %v2160_v58 = vpop.f32.mrb[7].mxu0  ;;  %2184 = vmax.xlane.f32.xlu0 %v2183_v57  ;;  %v4852_v7 = vadd.f32 %v3817_v55, %v4589_v31 }
 0xef8   :  { %v2175_v8 = vadd.f32 %v2160_v58, %v4591_v56 }
 0xef9   :  { %v2198_v10 = vsel %vm676_vm15, %v4852_v7, -inf }
 0xefa   :  { %v3810_v59 = vpop.f32.mrb[28].mxu1  ;;  %v2195_v13 = vsel %vm676_vm15, %v2175_v8, -inf }
 0xefb   :  { %v4846_v61 = vadd.f32 %v3810_v59, %v4589_v31  ;;  %2187 = vmax.xlane.f32.xlu0 %v2186_v60  ;;  %v2069_v63 = vpop.f32.mrb[29].mxu1 }
 0xefc   :  { %v2173_v4 = vadd.f32 %v2069_v63, %v4591_v56 }
 0xefd   :  { %v2192_v5 = vsel %vm676_vm15, %v4846_v61, -inf }
 0xefe   :  { %v2189_v9 = vsel %vm676_vm15, %v2173_v4, -inf }
 0xeff   :  { %2193 = vmax.xlane.f32.xlu0 %v2192_v5  ;;  %2190 = vmax.xlane.f32.xlu1 %v2189_v9 }
 0xf03   :  { %2199 = vmax.xlane.f32.xlu0 %v2198_v10  ;;  %2196 = vmax.xlane.f32.xlu1 %v2195_v13 }
 0xf14   :  { %4229 = vrot.lane.b32.xlu1 %v4798_v22, %s4366_s1 }
 0xf7b   :  { %v2182_v16 = vpop.xlane.xlu1 %2181 }
 0xf7c   :  { %v2202_v18 = vsub.f32 %v2170_v47, %v2182_v16  ;;  %v2179_v31 = vpop.xlane.xlu0 %2178 }
 0xf7d   :  { %v2201_v19 = vsub.f32 %v2169_v49, %v2179_v31 }
 0xf7e   :  { %v2211_v20 = vmul.f32 1.442695, %v2202_v18 }
 0xf7f   :  { %v2209_v56 = vmul.f32 1.442695, %v2201_v19 }
 0xf80   :  { %4292 = vpow2.f32 %v2211_v20 }
 0xf81   :  { %4294 = vpow2.f32 %v2209_v56 }
 0xf84   :  { %v2185_v23 = vpop.xlane.xlu0 %2184 }
 0xf85   :  { %v2203_v33 = vsub.f32 %v2171_v53, %v2185_v23 }
 0xf87   :  { %v2213_v41 = vmul.f32 1.442695, %v2203_v33 }
 0xf88   :  { %v2188_v39 = vpop.xlane.xlu0 %2187 }
 0xf89   :  { %v2204_v24 = vsub.f32 %v2172_v54, %v2188_v39 }
 0xf8a   :  { %v4293_v25 = vpop.eup %4292 }
 0xf8b   :  { %v4295_v26 = vpop.eup %4294  ;;  %v2215_v27 = vmul.f32 1.442695, %v2204_v24  ;;  %v2228_v28 = vsel %vm676_vm15, %v4293_v25, 0.0 }
 0xf8c   :  { %2229 = vadd.xlane.f32.xlu0 %v2228_v28  ;;  %v2191_v29 = vpop.xlane.xlu1 %2190  ;;  %v2225_v32 = vsel %vm676_vm15, %v4295_v26, 0.0  ;;  %v2194_v21 = vpop.xlane.xlu0 %2193 }
 0xf8d   :  { %4296 = vpow2.f32 %v2215_v27  ;;  %2226 = vadd.xlane.f32.xlu1 %v2225_v32  ;;  %v2205_v42 = vsub.f32 %v2173_v4, %v2191_v29  ;;  %v2206_v54 = vsub.f32 %v4846_v61, %v2194_v21  ;;  %v3397_v21 = vld [vmem:[%s5060_s5 + $0x38] sm:$0xff] }
 0xf8f   :  { %v2217_v15 = vmul.f32 1.442695, %v2205_v42  ;;  %v2219_v57 = vmul.f32 1.442695, %v2206_v54 }
 0xf90   :  { %v2197_v34 = vpop.xlane.xlu1 %2196  ;;  %v2200_v52 = vpop.xlane.xlu0 %2199 }
 0xf91   :  { %v2207_v35 = vsub.f32 %v2175_v8, %v2197_v34  ;;  %v2208_v53 = vsub.f32 %v4852_v7, %v2200_v52 }
 0xf93   :  { %v2221_v36 = vmul.f32 1.442695, %v2207_v35  ;;  %v2223_v55 = vmul.f32 1.442695, %v2208_v53 }
 0xf94   :  { %v4230_v43 = vpop.permute.xlu1 %4229 }
 0xf95   :  { %v4232_v1 = vunpack.i.h.bf16 %v4230_v43  ;;  %v4231_v44 = vunpack.i.l.bf16 %v4230_v43  ;;  %4298 = vpow2.f32 %v2221_v36 }
 0xf96   :  { %4300 = vpow2.f32 %v2213_v41 }
 0xf97   :  { %v4863_v17 = vpop.eup %4296  ;;  %v4075_v14 = vpack.c.bf16 %v4232_v1, %v4231_v44  ;;  %4302 = vpow2.f32 %v2217_v15 }
 0xf98   :  { %v2234_v45 = vsel %vm676_vm15, %v4863_v17, 0.0  ;;  %4304 = vpow2.f32 %v2223_v55 }
 0xf99   :  { %2235 = vadd.xlane.f32.xlu0 %v2234_v45  ;;  %4076 = vmatprep.subr.bf16.mxu1 %v4075_v14  ;;  %4306 = vpow2.f32 %v2219_v57  ;;  %v3395_v45 = vld [vmem:[%s5060_s5 + $0x28] sm:$0xff]  ;;  %v2951_v57 = vrot.slane %v4789_v62, %v1449_v3 }
 0xf9a   :  { %4078 = vmatpush3.bf16.msra.mxu1 %v4075_v14  ;;  %3832 = vmatprep.subr.mxu0 %v3395_v45 }
 0xf9b   :  { %3833 = vmatpush3.msra.mxu0 %v3395_v45  ;;  %v3433_v45 = vld [vmem:[%s5062_s7 + $0xe8] sm:$0xff] }
 0xf9f   :  { %v4867_v46 = vpop.eup %4298 }
 0xfa0   :  { %v2243_v47 = vsel %vm676_vm15, %v4867_v46, 0.0  ;;  %v4301_v48 = vpop.eup %4300 }
 0xfa1   :  { %2244 = vadd.xlane.f32.xlu1 %v2243_v47  ;;  %v2231_v49 = vsel %vm676_vm15, %v4301_v48, 0.0  ;;  %v4303_v50 = vpop.eup %4302  ;;  %v3394_v47 = vld [vmem:[%s5060_s5 + $0x20] sm:$0xff] }
 0xfa2   :  { %v2237_v51 = vsel %vm676_vm15, %v4303_v50, 0.0  ;;  %v4879_v58 = vpop.eup %4304  ;;  %3837 = vmatprep.subr.mxu0 %v3394_v47 }
 0xfa3   :  { %v2246_v59 = vsel %vm676_vm15, %v4879_v58, 0.0  ;;  %v4307_v60 = vpop.eup %4306 }
 0xfa4   :  { %v2240_v63 = vsel %vm676_vm15, %v4307_v60, 0.0 }
 0xfa5   :  { %2232 = vadd.xlane.f32.xlu1 %v2231_v49 }
 0xfa9   :  { %2238 = vadd.xlane.f32.xlu1 %v2237_v51  ;;  %v3396_v51 = vld [vmem:[%s5060_s5 + $0x30] sm:$0xff] }
 0xfaf   :  { %4234 = vrot.lane.b32.xlu0 %v4798_v22, %s4367_s26 }
 0xfba   :  { %4239 = vrot.lane.b32.xlu1 %v4798_v22, %s4368_s27 }
 0xfce   :  { %2247 = vadd.xlane.f32.xlu0 %v2246_v59 }
 0xfd2   :  { %2241 = vadd.xlane.f32.xlu0 %v2240_v63 }
 0xfe8   :  { %4244 = vrot.lane.b32.xlu0 %v4798_v22, %s4369_s30 }
0x1019   :  { %v2230_v4 = vpop.xlane.xlu0 %2229 }
0x101a   :  { %4308 = vrcp.f32 %v2230_v4  ;;  %v2227_v61 = vpop.xlane.xlu1 %2226 }
0x101b   :  { %4310 = vrcp.f32 %v2227_v61 }
0x1024   :  { %v4309_v5 = vpop.eup %4308 }
0x1025   :  { %v4311_v7 = vpop.eup %4310  ;;  %v2252_v10 = vmul.f32 %v4309_v5, %v4293_v25 }
0x1026   :  { %v2236_v8 = vpop.xlane.xlu0 %2235  ;;  %v2250_v9 = vmul.f32 %v4311_v7, %v4295_v26 }
0x1027   :  { %4312 = vrcp.f32 %v2236_v8 }
0x1028   :  { %3822 = vmatprep.mubr.msk.f32.mxu1 %vm676_vm15, %v2250_v9 }
0x1029   :  { %3823 = vmatmul.mubr.msk.f32.vlgmr.msra.gmra.mrb[30].mxu1 %vm676_vm15, %v2252_v10 }
0x102a   :  { %v4235_v13 = vpop.permute.xlu0 %4234 }
0x102b   :  { %v4237_v16 = vunpack.i.h.bf16 %v4235_v13  ;;  %v4236_v18 = vunpack.i.l.bf16 %v4235_v13 }
0x102d   :  { %v4079_v31 = vpack.c.bf16 %v4237_v16, %v4236_v18 }
0x102e   :  { %v2245_v19 = vpop.xlane.xlu1 %2244 }
0x102f   :  { %4080 = vmatprep.subr.bf16.mxu1 %v4079_v31 }
0x1030   :  { %4082 = vmatpush3.bf16.msra.mxu1 %v4079_v31 }
0x1031   :  { %v4313_v24 = vpop.eup %4312 }
0x1032   :  { %v2233_v22 = vpop.xlane.xlu1 %2232  ;;  %v2256_v28 = vmul.f32 %v4313_v24, %v4863_v17  ;;  %v3420_v24 = vld [vmem:[%s5062_s7 + $0x80] sm:$0xff] }
0x1033   :  { %4314 = vrcp.f32 %v2233_v22  ;;  %v3415_v22 = vld [vmem:[%s5061_s6 + $0x28] sm:$0xff] }
0x1036   :  { %v2239_v20 = vpop.xlane.xlu1 %2238 }
0x1037   :  { %4316 = vrcp.f32 %v2239_v20 }
0x1038   :  { %4318 = vrcp.f32 %v2245_v19  ;;  %v3414_v19 = vld [vmem:[%s5061_s6 + $0x20] sm:$0xff] }
0x1039   :  { %v4091_v20 = vpack.c.bf16 %v3415_v22, %v3414_v19 }
0x103a   :  { %v4240_v56 = vpop.permute.xlu1 %4239 }
0x103b   :  { %v4242_v23 = vunpack.i.h.bf16 %v4240_v56  ;;  %v4241_v39 = vunpack.i.l.bf16 %v4240_v56  ;;  %v3416_v56 = vld [vmem:[%s5061_s6 + $0x30] sm:$0xff] }
0x103d   :  { %v4315_v25 = vpop.eup %4314  ;;  %v4083_v26 = vpack.c.bf16 %v4242_v23, %v4241_v39  ;;  %v3417_v23 = vld [vmem:[%s5061_s6 + $0x38] sm:$0xff] }
0x103e   :  { %v2254_v27 = vmul.f32 %v4315_v25, %v4301_v48  ;;  %v4095_v39 = vpack.c.bf16 %v3417_v23, %v3416_v56  ;;  %v3421_v25 = vld [vmem:[%s5062_s7 + $0x88] sm:$0xff] }
0x103f   :  { %4084 = vmatprep.subr.bf16.mxu1 %v4083_v26 }
0x1040   :  { %3829 = vmatprep.mubr.msk.f32.mxu1 %vm676_vm15, %v2254_v27  ;;  %v4099_v27 = vpack.c.bf16 %v3421_v25, %v3420_v24 }
0x1041   :  { %v4317_v29 = vpop.eup %4316  ;;  %3830 = vmatmul.mubr.msk.f32.vlgmr.msra.gmra.mrb[32].mxu1 %vm676_vm15, %v2256_v28  ;;  %v3423_v28 = vld [vmem:[%s5062_s7 + $0x98] sm:$0xff] }
0x1042   :  { %4086 = vmatpush3.bf16.msra.mxu1 %v4083_v26  ;;  %v2258_v32 = vmul.f32 %v4317_v29, %v4303_v50  ;;  %v4319_v43 = vpop.eup %4318  ;;  %v3422_v26 = vld [vmem:[%s5062_s7 + $0x90] sm:$0xff] }
0x1043   :  { %v2262_v14 = vmul.f32 %v4319_v43, %v4867_v46  ;;  %v4103_v29 = vpack.c.bf16 %v3423_v28, %v3422_v26  ;;  %v3429_v43 = vld [vmem:[%s5062_s7 + $0xc8] sm:$0xff] }
0x1044   :  { %3846 = vmatprep.mubr.msk.f32.mxu1 %vm676_vm15, %v2258_v32  ;;  %v3424_v32 = vld [vmem:[%s5062_s7 + $0xa0] sm:$0xff] }
0x105b   :  { %v2248_v33 = vpop.xlane.xlu0 %2247 }
0x105f   :  { %v2242_v34 = vpop.xlane.xlu0 %2241 }
0x1060   :  { %4320 = vrcp.f32 %v2242_v34 }
0x1061   :  { %4322 = vrcp.f32 %v2248_v33  ;;  %v3425_v33 = vld [vmem:[%s5062_s7 + $0xa8] sm:$0xff] }
0x1062   :  { %v4107_v34 = vpack.c.bf16 %v3425_v33, %v3424_v32  ;;  %v3225_v32 = vld [vmem:[%s5063_s8 + $0x8] sm:$0xff] }
0x1063   :  { %v4245_v35 = vpop.permute.xlu0 %4244 }
0x1064   :  { %v4247_v36 = vunpack.i.h.bf16 %v4245_v35  ;;  %v4246_v41 = vunpack.i.l.bf16 %v4245_v35  ;;  %v3426_v35 = vld [vmem:[%s5062_s7 + $0xb0] sm:$0xff] }
0x1066   :  { %v4087_v42 = vpack.c.bf16 %v4247_v36, %v4246_v41  ;;  %v3427_v36 = vld [vmem:[%s5062_s7 + $0xb8] sm:$0xff] }
0x1067   :  { %v4111_v41 = vpack.c.bf16 %v3427_v36, %v3426_v35  ;;  %v3227_v35 = vld [vmem:[%s5063_s8 + $0x18] sm:$0xff] }
0x1068   :  { %4088 = vmatprep.subr.bf16.mxu1 %v4087_v42 }
0x106a   :  { %v4321_v1 = vpop.eup %4320 }
0x106b   :  { %v2260_v44 = vmul.f32 %v4321_v1, %v4307_v60  ;;  %v4323_v17 = vpop.eup %4322 }
0x106c   :  { %v2264_v15 = vmul.f32 %v4323_v17, %v4879_v58  ;;  %v3431_v17 = vld [vmem:[%s5062_s7 + $0xd8] sm:$0xff] }
0x106d   :  { %3847 = vmatmul.mubr.msk.f32.vlgmr.msra.gmra.mrb[34].mxu1 %vm676_vm15, %v2260_v44  ;;  %v3430_v44 = vld [vmem:[%s5062_s7 + $0xd0] sm:$0xff] }
0x106e   :  { %4090 = vmatpush3.bf16.msra.mxu1 %v4087_v42  ;;  %3858 = vmatprep.mubr.msk.f32.mxu1 %vm676_vm15, %v2262_v14  ;;  %v3428_v42 = vld [vmem:[%s5062_s7 + $0xc0] sm:$0xff]  ;;  %v4119_v14 = vpack.c.bf16 %v3431_v17, %v3430_v44 }
0x106f   :  { %4092 = vmatprep.subr.bf16.mxu1 %v4091_v20  ;;  %v4115_v1 = vpack.c.bf16 %v3429_v43, %v3428_v42 }
0x1071   :  { %3859 = vmatmul.mubr.msk.f32.vlgmr.msra.gmra.mrb[36].mxu1 %vm676_vm15, %v2264_v15  ;;  %v3432_v15 = vld [vmem:[%s5062_s7 + $0xe0] sm:$0xff] }
0x1072   :  { %4094 = vmatpush3.bf16.msra.mxu1 %v4091_v20 }
0x1073   :  { %4096 = vmatprep.subr.bf16.mxu1 %v4095_v39 }
0x1076   :  { %4098 = vmatpush3.bf16.msra.mxu1 %v4095_v39 }
0x10fc   :  { %v3824_v46 = vpop.f32.mrb[30].mxu1 }
0x10fd   :  { %v2348_v48 = vpop.f32.mrb[31].mxu1 }
0x1114   :  { %v3831_v49 = vpop.f32.mrb[32].mxu1 }
0x1115   :  { %v2435_v50 = vpop.f32.mrb[33].mxu1 }
0x1116   :  { %3834 = vmatprep.mubr.msk.f32.mxu0 %vm311_vm3, %v2435_v50 }
0x1117   :  { %3835 = vmatmul.mubr.msk.f32.vlgmr.msra.gmra.mrb[8].mxu0 %vm311_vm3, %v3831_v49 }
0x1118   :  { %3839 = vmatprep.mubr.msk.f32.mxu0 %vm311_vm3, %v2348_v48  ;;  %3838 = vmatpush3.msra.mxu0 %v3394_v47  ;;  %v4123_v47 = vpack.c.bf16 %v3433_v45, %v3432_v15 }
0x1119   :  { %3849 = vmatprep.subr.mxu0 %v3396_v51 }
0x111f   :  { %3840 = vmatmul.mubr.msk.f32.vlgmr.msra.gmra.mrb[8].mxu0 %vm311_vm3, %v3824_v46 }
0x1120   :  { %3850 = vmatpush3.msra.mxu0 %v3396_v51 }
0x1121   :  { %3861 = vmatprep.subr.mxu0 %v3397_v21 }
0x1140   :  { %v3848_v52 = vpop.f32.mrb[34].mxu1 }
0x1141   :  { %v2684_v53 = vpop.f32.mrb[35].mxu1 }
0x1142   :  { %3851 = vmatprep.mubr.msk.f32.mxu0 %vm311_vm3, %v2684_v53 }
0x1143   :  { %3852 = vmatmul.mubr.msk.f32.vlgmr.msra.gmra.mrb[8].mxu0 %vm311_vm3, %v3848_v52  ;;  %v2983_v52 = vrot.slane %v4789_v62, %v4734_v0 }
0x1144   :  { %3862 = vmatpush3.msra.mxu0 %v3397_v21  ;;  %v3860_v54 = vpop.f32.mrb[36].mxu1 }
0x1145   :  { %v2854_v55 = vpop.f32.mrb[37].mxu1  ;;  %4100 = vmatprep.subr.bf16.mxu0 %v4099_v27 }
0x1146   :  { %3863 = vmatprep.mubr.msk.f32.mxu0 %vm311_vm3, %v2854_v55 }
0x114b   :  { %3864 = vmatmul.mubr.msk.f32.vlgmr.msra.gmra.mrb[8].mxu0 %vm311_vm3, %v3860_v54 }
0x114c   :  { %4102 = vmatpush3.bf16.msra.mxu0 %v4099_v27 }
0x114d   :  { %4104 = vmatprep.subr.bf16.mxu0 %v4103_v29 }
0x1150   :  { %4106 = vmatpush3.bf16.msra.mxu0 %v4103_v29  ;;  %v3224_v29 = vld [vmem:[%s5063_s8] sm:$0xff] }
0x1151   :  { %4108 = vmatprep.subr.bf16.mxu0 %v4107_v34  ;;  %v4131_v33 = vpack.c.bf16 %v3225_v32, %v3224_v29 }
0x1153   :  { %4132 = vmatprep.subr.bf16.mxu1 %v4131_v33 }
0x1154   :  { %4110 = vmatpush3.bf16.msra.mxu0 %v4107_v34  ;;  %v3226_v34 = vld [vmem:[%s5063_s8 + $0x10] sm:$0xff]  ;;  %s4370_s8 = smov [#allocation2]  }
0x1155   :  { %4112 = vmatprep.subr.bf16.mxu0 %v4111_v41  ;;  %v4135_v36 = vpack.c.bf16 %v3227_v35, %v3226_v34 }
0x1158   :  { %4114 = vmatpush3.bf16.msra.mxu0 %v4111_v41 }
0x1159   :  { %4116 = vmatprep.subr.bf16.mxu0 %v4115_v1 }
0x115c   :  { %4118 = vmatpush3.bf16.msra.mxu0 %v4115_v1 }
0x115d   :  { %4120 = vmatprep.subr.bf16.mxu0 %v4119_v14 }
0x1160   :  { %4122 = vmatpush3.bf16.msra.mxu0 %v4119_v14  ;;  %v3436_v14 = vld [vmem:[%s5064_s9 + $0x10] sm:$0xff]  ;;  %s3320_s9 = sshll.u32 %s4370_s8, 4  ;;  %s3321_s9 = int_to_ptr.vmem [resolvable:$true] %s3320_s9 }
0x1161   :  { %4124 = vmatprep.subr.bf16.mxu0 %v4123_v47  ;;  %v3215_v15 = vrot.slane %v3436_v14, %v4452_v11  ;;  %s4332_s19 = scalar_lea.vmem %s3321_s9, 256  ;;  %p4337_p1 = scmp.lt.s32.totalorder %s3321_s9, %s3321_s9 }
0x1162   :  { %p4333_p0 = scmp.ne.s32.totalorder %s3321_s9, %s4332_s19  ;;  %p4338_p2 = scmp.lt.s32.totalorder %s4332_s19, %s4332_s19 }
0x1164   :  { %4126 = vmatpush3.bf16.msra.mxu0 %v4123_v47  ;;  %p4339_p3 = por %p4338_p2, %p4337_p1 }
0x1166   :  { %p4340_p4 = pnand %p4339_p3, %p4333_p0 }
0x121e   :  { %v3865_v58 = vpop.f32.mrb[8].mxu0 }
0x121f   :  { %v2947_v59 = vadd.f32 %v3865_v58, %v4762_v37  ;;  %v2935_v60 = vpop.f32.mrb[9].mxu0  ;;  %v2989_v58 = vrot.slane %v4789_v62, %v1487_v2  ;;  %v3000_v2 = vrot.slane %v4789_v62, %v1497_v40 }
0x1220   :  { %v2946_v63 = vadd.f32 %v2935_v60, %v4764_v38 }
0x1221   :  { %v4922_v4 = vadd.f32 %v2951_v57, %v2947_v59 }
0x1222   :  { %v4924_v61 = vadd.f32 %v2951_v57, %v2946_v63 }
0x1223   :  { %v2957_v5 = vsel %vm180_vm2, %v4922_v4, 0.0 }
0x1224   :  { %2958 = vadd.xlane.f32.xlu0 %v2957_v5  ;;  %v2954_v7 = vsel %vm180_vm2, %v4924_v61, 0.0 }
0x1225   :  { %2955 = vadd.xlane.f32.xlu1 %v2954_v7  ;;  %v3434_v7 = vld [vmem:[%s5062_s7 + $0xf0] sm:$0xff] }
0x12b1   :  { %v2959_v8 = vpop.xlane.xlu0 %2958 }
0x12b2   :  { %v2961_v3 = vmul.f32 0.03125, %v2959_v8  ;;  %v2956_v9 = vpop.xlane.xlu1 %2955  ;;  %v3435_v8 = vld [vmem:[%s5062_s7 + $0xf8] sm:$0xff] }
0x12b3   :  { %v2960_v10 = vmul.f32 0.03125, %v2956_v9 }
0x12b4   :  { %v4931_v37 = vsub.f32 %v4922_v4, %v2961_v3  ;;  %v4127_v3 = vpack.c.bf16 %v3435_v8, %v3434_v7 }
0x12b5   :  { %v4934_v38 = vsub.f32 %v4924_v61, %v2960_v10 }
0x12b6   :  { %v2965_v13 = vmul.f32 %v4931_v37, %v4931_v37  ;;  %4128 = vmatprep.subr.bf16.mxu0 %v4127_v3 }
0x12b7   :  { %v2964_v16 = vmul.f32 %v4934_v38, %v4934_v38  ;;  %4130 = vmatpush3.bf16.msra.mxu0 %v4127_v3 }
0x12b8   :  { %v2969_v18 = vsel %vm180_vm2, %v2965_v13, 0.0 }
0x12b9   :  { %2970 = vadd.xlane.f32.xlu0 %v2969_v18  ;;  %v2966_v31 = vsel %vm180_vm2, %v2964_v16, 0.0  ;;  %v3181_v18 = vrot.slane %v4789_v62, %v1677_v30 }
0x12ba   :  { %2967 = vadd.xlane.f32.xlu1 %v2966_v31 }
0x1346   :  { %v2971_v46 = vpop.xlane.xlu0 %2970 }
0x1347   :  { %v2973_v48 = vmul.f32 0.03125, %v2971_v46  ;;  %v2968_v49 = vpop.xlane.xlu1 %2967 }
0x1348   :  { %v2972_v50 = vmul.f32 0.03125, %v2968_v49  ;;  %v3221_v49 = vrot.slane %v3436_v14, %v4455_v12 }
0x1349   :  { %v2975_v51 = vadd.f32 1e-05, %v2973_v48 }
0x134a   :  { %v2974_v21 = vadd.f32 1e-05, %v2972_v50 }
0x134b   :  { %4324 = vrsqrt.f32 %v2975_v51 }
0x134c   :  { %4326 = vrsqrt.f32 %v2974_v21 }
0x1355   :  { %v4325_v53 = vpop.eup %4324 }
0x1356   :  { %v4327_v54 = vpop.eup %4326  ;;  %v2979_v55 = vmul.f32 %v4325_v53, %v4931_v37  ;;  %v3231_v53 = vrot.slane %v3436_v14, %v4734_v0 }
0x1357   :  { %v2978_v57 = vmul.f32 %v4327_v54, %v4934_v38 }
0x1358   :  { %v2985_v59 = vmul.f32 %v2983_v52, %v2979_v55 }
0x1359   :  { %v2984_v60 = vmul.f32 %v2983_v52, %v2978_v57 }
0x135a   :  { %v2991_v5 = vadd.f32 %v2989_v58, %v2985_v59 }
0x135b   :  { %v2990_v63 = vadd.f32 %v2989_v58, %v2984_v60 }
0x135d   :  { %3874 = vmatprep.mubr.msk.f32.mxu1 %vm180_vm2, %v2990_v63 }
0x135e   :  { %3875 = vmatmul.mubr.msk.f32.vlgmr.msra.gmra.mrb[38].mxu1 %vm180_vm2, %v2991_v5 }
0x135f   :  { %4134 = vmatpush3.bf16.msra.mxu1 %v4131_v33 }
0x1360   :  { %4136 = vmatprep.subr.bf16.mxu1 %v4135_v36 }
0x1363   :  { %4138 = vmatpush3.bf16.msra.mxu1 %v4135_v36 }
0x1431   :  { %v3876_v9 = vpop.f32.mrb[38].mxu1 }
0x1432   :  { %v3079_v10 = vadd.f32 %v3876_v9, %v3000_v2  ;;  %v3073_v37 = vpop.f32.mrb[39].mxu1 }
0x1433   :  { %v3074_v38 = vadd.f32 %v3073_v37, %v3000_v2 }
0x1434   :  { %v3083_v16 = vmax.f32 %v3079_v10, 0.0 }
0x1435   :  { %v3082_v13 = vmax.f32 %v3074_v38, 0.0 }
0x1437   :  { %3909 = vmatprep.mubr.f32.mxu0 %v3082_v13 }
0x1438   :  { %3910 = vmatmul.mubr.f32.vlgmr.msra.gmra.mrb[10].mxu0 %v3083_v16 }
0x150b   :  { %v3911_v31 = vpop.f32.mrb[10].mxu0 }
0x150c   :  { %v3177_v19 = vadd.f32 %v3911_v31, %v4922_v4  ;;  %v3167_v22 = vpop.f32.mrb[11].mxu0 }
0x150d   :  { %v3176_v20 = vadd.f32 %v3167_v22, %v4924_v61 }
0x150e   :  { %v3183_v56 = vadd.f32 %v3181_v18, %v3177_v19 }
0x150f   :  { %v3182_v40 = vadd.f32 %v3181_v18, %v3176_v20 }
0x1510   :  { %v3189_v23 = vsel %vm180_vm2, %v3183_v56, 0.0 }
0x1511   :  { %3190 = vadd.xlane.f32.xlu0 %v3189_v23  ;;  %v3186_v39 = vsel %vm180_vm2, %v3182_v40, 0.0 }
0x1512   :  { %3187 = vadd.xlane.f32.xlu1 %v3186_v39 }
0x159e   :  { %v3191_v24 = vpop.xlane.xlu0 %3190 }
0x159f   :  { %v3193_v25 = vmul.f32 0.03125, %v3191_v24  ;;  %v3188_v26 = vpop.xlane.xlu1 %3187 }
0x15a0   :  { %v3192_v6 = vmul.f32 0.03125, %v3188_v26 }
0x15a1   :  { %v3195_v27 = vsub.f32 %v3183_v56, %v3193_v25 }
0x15a2   :  { %v3194_v30 = vsub.f32 %v3182_v40, %v3192_v6 }
0x15a3   :  { %v3197_v62 = vmul.f32 %v3195_v27, %v3195_v27 }
0x15a4   :  { %v3196_v28 = vmul.f32 %v3194_v30, %v3194_v30 }
0x15a5   :  { %v3201_v4 = vsel %vm180_vm2, %v3197_v62, 0.0 }
0x15a6   :  { %3202 = vadd.xlane.f32.xlu0 %v3201_v4  ;;  %v3198_v61 = vsel %vm180_vm2, %v3196_v28, 0.0 }
0x15a7   :  { %3199 = vadd.xlane.f32.xlu1 %v3198_v61 }
0x1633   :  { %v3203_v41 = vpop.xlane.xlu0 %3202 }
0x1634   :  { %v3205_v42 = vmul.f32 0.03125, %v3203_v41  ;;  %v3200_v43 = vpop.xlane.xlu1 %3199 }
0x1635   :  { %v3204_v1 = vmul.f32 0.03125, %v3200_v43 }
0x1636   :  { %v3207_v44 = vadd.f32 1e-05, %v3205_v42 }
0x1637   :  { %v3206_v17 = vadd.f32 1e-05, %v3204_v1 }
0x1638   :  { %4328 = vrsqrt.f32 %v3207_v44 }
0x1639   :  { %4330 = vrsqrt.f32 %v3206_v17 }
0x1642   :  { %v4329_v45 = vpop.eup %4328 }
0x1643   :  { %v4331_v47 = vpop.eup %4330  ;;  %v3211_v46 = vmul.f32 %v4329_v45, %v3195_v27 }
0x1644   :  { %v3210_v48 = vmul.f32 %v4331_v47, %v3194_v30 }
0x1645   :  { %v3217_v50 = vmul.f32 %v3215_v15, %v3211_v46 }
0x1646   :  { %v3216_v51 = vmul.f32 %v3215_v15, %v3210_v48 }
0x1647   :  { %v3223_v52 = vadd.f32 %v3221_v49, %v3217_v50 }
0x1648   :  { %v3222_v21 = vadd.f32 %v3221_v49, %v3216_v51 }
0x164a   :  { %3920 = vmatprep.mubr.msk.f32.mxu1 %vm180_vm2, %v3222_v21 }
0x164b   :  { %3921 = vmatmul.mubr.msk.f32.vlgmr.msra.gmra.mrb[40].mxu1 %vm180_vm2, %v3223_v52 }
0x171e   :  { %v3922_v54 = vpop.f32.mrb[40].mxu1 }
0x171f   :  { %v3310_v11 = vadd.f32 %v3922_v54, %v3231_v53  ;;  %v3304_v55 = vpop.f32.mrb[41].mxu1 }
0x1720   :  { %v3305_v57 = vadd.f32 %v3304_v55, %v3231_v53 }
0x1721   :  { %3314 = vst [vmem:[#allocation2 + $0x8] sm:$0xff] %v3310_v11 }
0x1722   :  { %3313 = vst [vmem:[#allocation2] sm:$0xff] %v3305_v57 }
0x1723   :  { %4343 = shalt.err (!%p4340_p4)
}
0x1724   :  { %s4344_s22 = scalar_lea.hbm %s5065_s10, 256 }
0x1725   :  { %p4345_p5 = scmp.ne.s32.totalorder %s5065_s10, %s4344_s22  ;;  %p4348_p6 = scmp.lt.u32.totalorder %s4344_s22, %s5065_s10 }
0x1727   :  { %p4350_p7 = pnand %p4348_p6, %p4345_p5 }
0x1729   :  { %4353 = shalt.err (!%p4350_p7)
}
0x172a   :  { %s4371_s27 = smov 128   ;;  %s4372_s30 = smov 8  }
0x172b   :  { %3326 = dma.vmem_to_hbm [thread:$0]  %s3321_s9, 256, %s5065_s10, [#allocation3], %s4371_s27, %s4371_s27, %s4372_s30  }
0x172c   :  { %4354 = dma.done.wait [#allocation3], 256  }
0x172d   :  { %4355 = vsyncadd [#allocation3], 4294967040 }
0x172e   :  { %3330 = vsyncpa [#allocation3], 1 }

</bundles_post_ra>
